<compile_context>
chip_gen: v5e
topology: v5e:2x2
jax: 0.10.0
libtpu: 0.0.40
codegen_flags: <defaults>
</compile_context>

<pallas_src>
import functools

import jax
import jax.numpy as jnp
from jax.experimental import pallas as pl
from jax.experimental.pallas import tpu as pltpu


def _round_up(x, m):
    return ((x + m - 1) // m) * m


# ------------------------------ fused kernel --------------------------------

def _decoder_fused_kernel(z_ref, bi_ref, *refs, n_px_layers, inject, neg_slope,
                          wo_resident, tile_out, compute_dtype):
    """Fused px_decoder (FCLayers + LeakyReLU, last_activation=True) followed by
    the output Linear + Sigmoid.

    refs = (w_0, beff_0, ..., w_{L-1}, beff_{L-1}, wo, bo, out_ref, h_scratch)
      w_l    : (n_in_l, n_hidden)  feature weight, compute_dtype (bf16/f32)
      beff_l : (n_batch, n_hidden) per-class bias  b_l + Woh_l[k]   (if inject[l])
               (1, n_hidden)       plain bias                       (otherwise)
      wo     : resident (n_hidden, n_out_pad)   [wo_resident]
               streamed (n_hidden, tile_out)    [fallback]
      bo     : (1, n_out_pad) or (1, tile_out)  float32

    wo_resident grid : (row tiles "parallel", col tiles "arbitrary")
    fallback grid    : (col tiles "arbitrary" OUTER, row tiles "arbitrary" INNER)
    NOTE: the column axis MUST stay in-order ("arbitrary"); the hidden-activation
    scratch is filled on its first step and reused afterwards.
    """
    n_w = 2 * n_px_layers
    wo_ref = refs[n_w]
    bo_ref = refs[n_w + 1]
    out_ref = refs[n_w + 2]
    h_ref = refs[n_w + 3]
    tile_n = z_ref.shape[0]

    if wo_resident:
        col_step = pl.program_id(1)
        row_off = 0                               # h scratch holds this row tile only
    else:
        col_step = pl.program_id(0)
        # h scratch holds ALL row tiles; row tiles iterate on the inner axis.
        row_off = pl.multiple_of(pl.program_id(1) * tile_n, 16)

    # Hidden activation depends only on the row tile -> compute it once (first
    # column step) into VMEM scratch and reuse it for every output column tile.
    @pl.when(col_step == 0)
    def _():
        x = z_ref[...].astype(compute_dtype)
        idx = bi_ref[...] if any(inject) else None          # (tile_n, 1) int32
        for l in range(n_px_layers):
            w_ref = refs[2 * l]
            b_ref = refs[2 * l + 1]
            acc = jnp.dot(x, w_ref[...], preferred_element_type=jnp.float32)
            if inject[l]:
                # One-hot covariate injection folded into a per-class bias
                # select (VPU) -> no one-hot tensor, no extra MXU pass.
                nb = b_ref.shape[0]
                bias = b_ref[nb - 1:nb, :]
                for k in range(nb - 2, -1, -1):
                    bias = jnp.where(idx == k, b_ref[k:k + 1, :], bias)
                acc = acc + bias
            else:
                acc = acc + b_ref[0:1, :]
            acc = jnp.maximum(acc, neg_slope * acc)          # LeakyReLU
            x = acc.astype(compute_dtype)
        h_ref[pl.ds(row_off, tile_n), :] = x

    h = h_ref[pl.ds(row_off, tile_n), :]
    if wo_resident:
        col = pl.multiple_of(col_step * tile_out, 128)
        w = wo_ref[:, pl.ds(col, tile_out)]
        b = bo_ref[:, pl.ds(col, tile_out)]
    else:
        w = wo_ref[...]
        b = bo_ref[...]

    # Output layer for this lane-dense column tile: Linear + Sigmoid (f32).
    o = jnp.dot(h, w, preferred_element_type=jnp.float32) + b
    out_ref[...] = (1.0 / (1.0 + jnp.exp(-o))).astype(out_ref.dtype)


# ------------------------------ param prep -----------------------------------

def prepare_decoder_params(px_params, out_params, *, n_batch,
                           deeply_inject_covariates=True,
                           compute_dtype=jnp.bfloat16, tile_out=512):
    """One-time parameter preparation: fold one-hot weights into per-class
    biases, cast matmul weights to compute_dtype, pad Wo/bo to a lane-dense
    multiple of tile_out.  Done once, outside the forward call."""
    n_batch_eff = n_batch if n_batch > 1 else 0
    wo, bo = out_params
    n_hidden, n_output = wo.shape

    tile_out = max(128, _round_up(tile_out, 128))
    tile_out = min(tile_out, _round_up(n_output, 128))
    n_out_pad = _round_up(n_output, tile_out)

    inject_flags, flat_px = [], []
    for l, (wx, woh, b) in enumerate(px_params):
        inj = (l == 0 or deeply_inject_covariates) and n_batch_eff > 0
        inject_flags.append(inj)
        beff = (b + woh) if inj else b            # (n_batch, n_hidden) or (1, n_hidden)
        flat_px += [wx.astype(compute_dtype), beff.astype(jnp.float32)]

    wo_p = jnp.pad(wo, ((0, 0), (0, n_out_pad - n_output))).astype(compute_dtype)
    bo_p = jnp.pad(bo, ((0, 0), (0, n_out_pad - n_output))).astype(jnp.float32)

    return dict(flat_px=flat_px, inject=tuple(inject_flags), wo=wo_p, bo=bo_p,
                n_hidden=n_hidden, n_output=n_output, n_out_pad=n_out_pad,
                tile_out=tile_out, compute_dtype=compute_dtype)


# ------------------------------ forward --------------------------------------

def decoder_peakvi_forward(z, batch_index, prepared, *, tile_n=512,
                           negative_slope=0.01,
                           wo_resident_budget=20 * 1024 * 1024,
                           vmem_limit_bytes=48 * 1024 * 1024):
    """DecoderPeakVI.forward(z, batch_index) via one fused pallas_call."""
    N, n_input = z.shape
    n_hidden = prepared["n_hidden"]
    n_output = prepared["n_output"]
    n_out_pad = prepared["n_out_pad"]
    tile_out = prepared["tile_out"]
    cdt = prepared["compute_dtype"]
    flat_px = prepared["flat_px"]
    wo_p, bo_p = prepared["wo"], prepared["bo"]

    # Row tile: multiple of 16 (bf16 sublane packing); cap so the "parallel"
    # row axis keeps >= 2 tiles (feeds both v7x TensorCores on small batches).
    tile_n = max(16, _round_up(tile_n, 16))
    tile_n = min(tile_n, max(16, _round_up(pl.cdiv(N, 2), 16)))
    n_pad = _round_up(N, tile_n)
    n_row_tiles = n_pad // tile_n
    n_col_tiles = n_out_pad // tile_out

    if n_pad != N:
        z = jnp.pad(z, ((0, n_pad - N), (0, 0)))
        batch_index = jnp.pad(batch_index, ((0, n_pad - N), (0, 0)))
    batch_index = batch_index.astype(jnp.int32)

    # Residency plan (v7x-safe): Pallas double-buffers inputs, so budget 2x Wo.
    wo_bytes = n_hidden * n_out_pad * jnp.dtype(cdt).itemsize
    wo_resident = 2 * wo_bytes <= wo_resident_budget

    kernel = functools.partial(
        _decoder_fused_kernel, n_px_layers=len(flat_px) // 2,
        inject=prepared["inject"], neg_slope=negative_slope,
        wo_resident=wo_resident, tile_out=tile_out, compute_dtype=cdt)

    # px weights / biases: constant index maps -> resident, fetched once.
    px_specs = [pl.BlockSpec(a.shape, lambda i, j: (0, 0)) for a in flat_px]

    if wo_resident:
        # grid = (rows "parallel", cols "arbitrary"): Wo fetched ONCE (constant
        # index map), sliced per lane-dense column tile inside the kernel.
        grid = (n_row_tiles, n_col_tiles)
        in_specs = [
            pl.BlockSpec((tile_n, n_input), lambda i, j: (i, 0)),  # z rows
            # batch_index is lane-sparse (tile_n,1); cost accepted (tiny DMA).
            pl.BlockSpec((tile_n, 1), lambda i, j: (i, 0)),
            *px_specs,
            pl.BlockSpec((n_hidden, n_out_pad), lambda i, j: (0, 0)),  # Wo resident
            pl.BlockSpec((1, n_out_pad), lambda i, j: (0, 0)),         # bo resident
        ]
        out_spec = pl.BlockSpec((tile_n, tile_out), lambda i, j: (i, j))
        scratch = pltpu.VMEM((tile_n, n_hidden), cdt)
        dims = ("parallel", "arbitrary")
    else:
        # Streaming fallback for very large n_output: columns OUTER so each Wo
        # column tile is DMA'd exactly once; hidden activations for ALL rows are
        # cached in VMEM during the first column pass.  Both axes stay
        # "arbitrary" so execution is strictly in-order (scratch correctness).
        grid = (n_col_tiles, n_row_tiles)
        in_specs = [
            pl.BlockSpec((tile_n, n_input), lambda j, i: (i, 0)),
            pl.BlockSpec((tile_n, 1), lambda j, i: (i, 0)),
            *px_specs,
            pl.BlockSpec((n_hidden, tile_out), lambda j, i: (0, j)),
            pl.BlockSpec((1, tile_out), lambda j, i: (0, j)),
        ]
        out_spec = pl.BlockSpec((tile_n, tile_out), lambda j, i: (i, j))
        scratch = pltpu.VMEM((n_pad, n_hidden), cdt)
        dims = ("arbitrary", "arbitrary")

    out = pl.pallas_call(
        kernel,
        out_shape=jax.ShapeDtypeStruct((n_pad, n_out_pad), jnp.float32),
        grid_spec=pltpu.PrefetchScalarGridSpec(
            num_scalar_prefetch=0,
            grid=grid,
            in_specs=in_specs,
            out_specs=out_spec,
            scratch_shapes=[scratch],
        ),
        compiler_params=pltpu.CompilerParams(
            dimension_semantics=dims, vmem_limit_bytes=vmem_limit_bytes),
    )(z, batch_index, *flat_px, wo_p, bo_p)

    # TODO(synk): emit the exact (N, n_output) out_shape (cdiv grid) to avoid
    # this trailing slice copy for very large peak counts.
    return out[:N, :n_output]


# ------------------------------ init & reference -----------------------------

def init_params(key, n_input, n_hidden, n_output, n_layers, n_batch,
                deeply_inject_covariates=True):
    """nn.Linear-shaped parameters (weights stored transposed; FCLayers weights
    split into the feature part wx and the one-hot covariate part woh)."""
    n_batch_eff = n_batch if n_batch > 1 else 0
    layers_dim = [n_input] + (n_layers - 1) * [n_hidden] + [n_hidden]
    px_params = []
    for i, (n_in, n_out) in enumerate(zip(layers_dim[:-1], layers_dim[1:])):
        inject = (i == 0 or deeply_inject_covariates) and n_batch_eff > 0
        fan_in = n_in + (n_batch_eff if inject else 0)
        bound = 1.0 / (fan_in ** 0.5)
        key, kw, kb = jax.random.split(key, 3)
        w_full = jax.random.uniform(kw, (fan_in, n_out), jnp.float32, -bound, bound)
        b = jax.random.uniform(kb, (1, n_out), jnp.float32, -bound, bound)
        wx = w_full[:n_in]
        woh = w_full[n_in:] if inject else None
        px_params.append((wx, woh, b))
    bound = 1.0 / (n_hidden ** 0.5)
    key, kw, kb = jax.random.split(key, 3)
    wo = jax.random.uniform(kw, (n_hidden, n_output), jnp.float32, -bound, bound)
    bo = jax.random.uniform(kb, (1, n_output), jnp.float32, -bound, bound)
    return px_params, (wo, bo)


def decoder_reference(z, batch_index, px_params, out_params, *, n_batch,
                      deeply_inject_covariates=True, negative_slope=0.01):
    """Plain-JAX f32 replica of DecoderPeakVI.forward
    (concat -> Linear -> LeakyReLU per px layer, then Linear -> Sigmoid)."""
    n_batch_eff = n_batch if n_batch > 1 else 0
    x = z
    if n_batch_eff > 0:
        oh = (jnp.arange(n_batch_eff)[None, :] == batch_index).astype(jnp.float32)
    for l, (wx, woh, b) in enumerate(px_params):
        inject = (l == 0 or deeply_inject_covariates) and n_batch_eff > 0
        if inject:
            xin = jnp.concatenate([x, oh], axis=-1)
            w = jnp.concatenate([wx, woh], axis=0)
        else:
            xin, w = x, wx
        x = xin @ w + b
        x = jnp.maximum(x, negative_slope * x)
    wo, bo = out_params
    return jax.nn.sigmoid(x @ wo + bo)


# ---------------------------------- main --------------------------------------

if __name__ == "__main__":
    # Small shapes consistent with DecoderPeakVI defaults (n_hidden=128,
    # n_layers=2).  N and n_output are deliberately NOT tile multiples so the
    # padding / lane-dense-output path is exercised.
    N = 300
    n_input = 16
    n_hidden = 128
    n_output = 200
    n_layers = 2
    n_batch = 3          # > 1 -> one-hot covariates injected into every layer

    key = jax.random.PRNGKey(0)
    kz, kb, kp = jax.random.split(key, 3)
    z = jax.random.normal(kz, (N, n_input), jnp.float32)
    batch_index = jax.random.randint(kb, (N, 1), 0, n_batch, jnp.int32)

    px_params, out_params = init_params(
        kp, n_input, n_hidden, n_output, n_layers, n_batch,
        deeply_inject_covariates=True)

    ref = decoder_reference(
        z, batch_index, px_params, out_params, n_batch=n_batch,
        deeply_inject_covariates=True)

    # 1) exact-precision check: f32 compute path, resident-Wo grid.
    prep_f32 = prepare_decoder_params(
        px_params, out_params, n_batch=n_batch, deeply_inject_covariates=True,
        compute_dtype=jnp.float32, tile_out=512)
    out_f32 = jax.block_until_ready(decoder_peakvi_forward(z, batch_index, prep_f32))
    assert out_f32.shape == (N, n_output), out_f32.shape
    err = float(jnp.max(jnp.abs(out_f32 - ref)))
    assert err < 1e-4, err

    # 2) perf config: bf16 weights / matmul operands (f32 accumulation),
    #    resident-Wo grid.
    prep_bf16 = prepare_decoder_params(
        px_params, out_params, n_batch=n_batch, deeply_inject_covariates=True,
        compute_dtype=jnp.bfloat16, tile_out=512)
    out_bf16 = jax.block_until_ready(decoder_peakvi_forward(z, batch_index, prep_bf16))
    err = float(jnp.max(jnp.abs(out_bf16 - ref)))
    assert err < 1e-2, err

    # 3) streaming fallback (forced by a zero residency budget): column-outer
    #    grid with the all-rows hidden-activation cache.
    out_stream = jax.block_until_ready(decoder_peakvi_forward(
        z, batch_index, prep_bf16, wo_resident_budget=0))
    err = float(jnp.max(jnp.abs(out_stream - ref)))
    assert err < 1e-2, err

    print("KERNEL_OK")
</pallas_src>

<mosaic_0001>
module attributes {stable_mosaic.version = 11 : i64} {
  func.func @_decoder_fused_kernel(%arg0: i32, %arg1: i32, %arg2: memref<160x16xf32, #tpu.memory_space<vmem>>, %arg3: memref<160x1xi32, #tpu.memory_space<vmem>>, %arg4: memref<16x128xf32, #tpu.memory_space<vmem>>, %arg5: memref<3x128xf32, #tpu.memory_space<vmem>>, %arg6: memref<128x128xf32, #tpu.memory_space<vmem>>, %arg7: memref<3x128xf32, #tpu.memory_space<vmem>>, %arg8: memref<128x256xf32, #tpu.memory_space<vmem>>, %arg9: memref<1x256xf32, #tpu.memory_space<vmem>>, %arg10: memref<160x256xf32, #tpu.memory_space<vmem>>, %arg11: memref<160x128xf32, #tpu.memory_space<vmem>>) attributes {dimension_semantics = [#tpu.dimension_semantics<parallel>, #tpu.dimension_semantics<arbitrary>], iteration_bounds = array<i64: 2, 1>, scalar_prefetch = 0 : i64, scratch_operands = 1 : i64, tpu.core_type = #tpu.core_type<tc>, window_params = [{transform_indices = @transform_0, window_bounds = array<i64: 160, 16>}, {transform_indices = @transform_1, window_bounds = array<i64: 160, 1>}, {pipeline_mode = #tpu.pipeline_mode<synchronous>, transform_indices = @transform_2, window_bounds = array<i64: 16, 128>}, {pipeline_mode = #tpu.pipeline_mode<synchronous>, transform_indices = @transform_3, window_bounds = array<i64: 3, 128>}, {pipeline_mode = #tpu.pipeline_mode<synchronous>, transform_indices = @transform_4, window_bounds = array<i64: 128, 128>}, {pipeline_mode = #tpu.pipeline_mode<synchronous>, transform_indices = @transform_5, window_bounds = array<i64: 3, 128>}, {pipeline_mode = #tpu.pipeline_mode<synchronous>, transform_indices = @transform_6, window_bounds = array<i64: 128, 256>}, {pipeline_mode = #tpu.pipeline_mode<synchronous>, transform_indices = @transform_7, window_bounds = array<i64: 1, 256>}, {transform_indices = @transform_8, window_bounds = array<i64: 160, 256>}]} {
    %c0_i32 = arith.constant 0 : i32
    %0 = arith.cmpi eq, %arg1, %c0_i32 : i32
    %1 = arith.extui %0 : i1 to i32
    %c0_i32_0 = arith.constant 0 : i32
    %2 = arith.cmpi ne, %1, %c0_i32_0 : i32
    scf.if %2 {
      %c0_9 = arith.constant 0 : index
      %c0_10 = arith.constant 0 : index
      %21 = vector.load %arg2[%c0_9, %c0_10] : memref<160x16xf32, #tpu.memory_space<vmem>>, vector<160x16xf32>
      %c0_11 = arith.constant 0 : index
      %c0_12 = arith.constant 0 : index
      %22 = vector.load %arg3[%c0_11, %c0_12] : memref<160x1xi32, #tpu.memory_space<vmem>>, vector<160x1xi32>
      %c0_13 = arith.constant 0 : index
      %c0_14 = arith.constant 0 : index
      %23 = vector.load %arg4[%c0_13, %c0_14] : memref<16x128xf32, #tpu.memory_space<vmem>>, vector<16x128xf32>
      %cst_15 = arith.constant dense<0.000000e+00> : vector<160x128xf32>
      %24 = tpu.matmul %21, %23, %cst_15 {dimension_numbers = #tpu.dot_dimension_numbers<[1], [0], [0], [1], [0, 0, 1, 1], [], []>} : vector<160x16xf32>, vector<16x128xf32>, vector<160x128xf32> -> vector<160x128xf32>
      %c2 = arith.constant 2 : index
      %c0_16 = arith.constant 0 : index
      %25 = vector.load %arg5[%c2, %c0_16] : memref<3x128xf32, #tpu.memory_space<vmem>>, vector<1x128xf32>
      %c1_i32 = arith.constant 1 : i32
      %26 = vector.broadcast %c1_i32 : i32 to vector<160x1xi32>
      %27 = arith.cmpi eq, %22, %26 : vector<160x1xi32>
      %c1 = arith.constant 1 : index
      %c0_17 = arith.constant 0 : index
      %28 = vector.load %arg5[%c1, %c0_17] : memref<3x128xf32, #tpu.memory_space<vmem>>, vector<1x128xf32>
      %29 = vector.shape_cast %27 : vector<160x1xi1> to vector<160x1xi1>
      %30 = vector.broadcast %29 : vector<160x1xi1> to vector<160x128xi1>
      %31 = vector.shape_cast %28 : vector<1x128xf32> to vector<1x128xf32>
      %32 = vector.broadcast %31 : vector<1x128xf32> to vector<160x128xf32>
      %33 = vector.shape_cast %25 : vector<1x128xf32> to vector<1x128xf32>
      %34 = vector.broadcast %33 : vector<1x128xf32> to vector<160x128xf32>
      %35 = arith.select %30, %32, %34 : vector<160x128xi1>, vector<160x128xf32>
      %c0_i32_18 = arith.constant 0 : i32
      %36 = vector.broadcast %c0_i32_18 : i32 to vector<160x1xi32>
      %37 = arith.cmpi eq, %22, %36 : vector<160x1xi32>
      %c0_19 = arith.constant 0 : index
      %c0_20 = arith.constant 0 : index
      %38 = vector.load %arg5[%c0_19, %c0_20] : memref<3x128xf32, #tpu.memory_space<vmem>>, vector<1x128xf32>
      %39 = vector.shape_cast %37 : vector<160x1xi1> to vector<160x1xi1>
      %40 = vector.broadcast %39 : vector<160x1xi1> to vector<160x128xi1>
      %41 = vector.shape_cast %38 : vector<1x128xf32> to vector<1x128xf32>
      %42 = vector.broadcast %41 : vector<1x128xf32> to vector<160x128xf32>
      %43 = arith.select %40, %42, %35 : vector<160x128xi1>, vector<160x128xf32>
      %44 = arith.addf %24, %43 : vector<160x128xf32>
      %cst_21 = arith.constant 0.00999999977 : f32
      %45 = vector.broadcast %cst_21 : f32 to vector<160x128xf32>
      %46 = arith.mulf %45, %44 : vector<160x128xf32>
      %47 = arith.maximumf %44, %46 : vector<160x128xf32>
      %c0_22 = arith.constant 0 : index
      %c0_23 = arith.constant 0 : index
      %48 = vector.load %arg6[%c0_22, %c0_23] : memref<128x128xf32, #tpu.memory_space<vmem>>, vector<128x128xf32>
      %cst_24 = arith.constant dense<0.000000e+00> : vector<160x128xf32>
      %49 = tpu.matmul %47, %48, %cst_24 {dimension_numbers = #tpu.dot_dimension_numbers<[1], [0], [0], [1], [0, 0, 1, 1], [], []>} : vector<160x128xf32>, vector<128x128xf32>, vector<160x128xf32> -> vector<160x128xf32>
      %c2_25 = arith.constant 2 : index
      %c0_26 = arith.constant 0 : index
      %50 = vector.load %arg7[%c2_25, %c0_26] : memref<3x128xf32, #tpu.memory_space<vmem>>, vector<1x128xf32>
      %c1_i32_27 = arith.constant 1 : i32
      %51 = vector.broadcast %c1_i32_27 : i32 to vector<160x1xi32>
      %52 = arith.cmpi eq, %22, %51 : vector<160x1xi32>
      %c1_28 = arith.constant 1 : index
      %c0_29 = arith.constant 0 : index
      %53 = vector.load %arg7[%c1_28, %c0_29] : memref<3x128xf32, #tpu.memory_space<vmem>>, vector<1x128xf32>
      %54 = vector.shape_cast %52 : vector<160x1xi1> to vector<160x1xi1>
      %55 = vector.broadcast %54 : vector<160x1xi1> to vector<160x128xi1>
      %56 = vector.shape_cast %53 : vector<1x128xf32> to vector<1x128xf32>
      %57 = vector.broadcast %56 : vector<1x128xf32> to vector<160x128xf32>
      %58 = vector.shape_cast %50 : vector<1x128xf32> to vector<1x128xf32>
      %59 = vector.broadcast %58 : vector<1x128xf32> to vector<160x128xf32>
      %60 = arith.select %55, %57, %59 : vector<160x128xi1>, vector<160x128xf32>
      %c0_i32_30 = arith.constant 0 : i32
      %61 = vector.broadcast %c0_i32_30 : i32 to vector<160x1xi32>
      %62 = arith.cmpi eq, %22, %61 : vector<160x1xi32>
      %c0_31 = arith.constant 0 : index
      %c0_32 = arith.constant 0 : index
      %63 = vector.load %arg7[%c0_31, %c0_32] : memref<3x128xf32, #tpu.memory_space<vmem>>, vector<1x128xf32>
      %64 = vector.shape_cast %62 : vector<160x1xi1> to vector<160x1xi1>
      %65 = vector.broadcast %64 : vector<160x1xi1> to vector<160x128xi1>
      %66 = vector.shape_cast %63 : vector<1x128xf32> to vector<1x128xf32>
      %67 = vector.broadcast %66 : vector<1x128xf32> to vector<160x128xf32>
      %68 = arith.select %65, %67, %60 : vector<160x128xi1>, vector<160x128xf32>
      %69 = arith.addf %49, %68 : vector<160x128xf32>
      %cst_33 = arith.constant 0.00999999977 : f32
      %70 = vector.broadcast %cst_33 : f32 to vector<160x128xf32>
      %71 = arith.mulf %70, %69 : vector<160x128xf32>
      %72 = arith.maximumf %69, %71 : vector<160x128xf32>
      %c0_34 = arith.constant 0 : index
      %c0_35 = arith.constant 0 : index
      %73 = vector.load %arg11[%c0_34, %c0_35] : memref<160x128xf32, #tpu.memory_space<vmem>>, vector<160x128xf32>
      tpu.vector_store %arg11[%c0_34, %c0_35], %72 {strides = array<i32>} : memref<160x128xf32, #tpu.memory_space<vmem>>, vector<160x128xf32>,
    } else {
    }
    %c0 = arith.constant 0 : index
    %c0_1 = arith.constant 0 : index
    %3 = vector.load %arg11[%c0, %c0_1] : memref<160x128xf32, #tpu.memory_space<vmem>>, vector<160x128xf32>
    %c256_i32 = arith.constant 256 : i32
    %4 = arith.muli %arg1, %c256_i32 : i32
    %5 = tpu.assume_multiple %4, 128 : i32
    %c0_2 = arith.constant 0 : index
    %6 = arith.index_cast %5 : i32 to index
    %7 = vector.load %arg8[%c0_2, %6] : memref<128x256xf32, #tpu.memory_space<vmem>>, vector<128x256xf32>
    %c0_3 = arith.constant 0 : index
    %8 = arith.index_cast %5 : i32 to index
    %9 = vector.load %arg9[%c0_3, %8] : memref<1x256xf32, #tpu.memory_space<vmem>>, vector<1x256xf32>
    %cst = arith.constant dense<0.000000e+00> : vector<160x256xf32>
    %10 = tpu.matmul %3, %7, %cst {dimension_numbers = #tpu.dot_dimension_numbers<[1], [0], [0], [1], [0, 0, 1, 1], [], []>} : vector<160x128xf32>, vector<128x256xf32>, vector<160x256xf32> -> vector<160x256xf32>
    %11 = vector.broadcast %9 : vector<1x256xf32> to vector<160x256xf32>
    %12 = arith.addf %10, %11 : vector<160x256xf32>
    %cst_4 = arith.constant 0.000000e+00 : f32
    %13 = vector.broadcast %cst_4 : f32 to vector<160x256xf32>
    %14 = arith.subf %13, %12 : vector<160x256xf32>
    %15 = math.exp %14 : vector<160x256xf32>
    %cst_5 = arith.constant 1.000000e+00 : f32
    %16 = vector.broadcast %cst_5 : f32 to vector<160x256xf32>
    %17 = arith.addf %16, %15 : vector<160x256xf32>
    %cst_6 = arith.constant 1.000000e+00 : f32
    %18 = vector.broadcast %cst_6 : f32 to vector<160x256xf32>
    %19 = arith.divf %18, %17 : vector<160x256xf32>
    %c0_7 = arith.constant 0 : index
    %c0_8 = arith.constant 0 : index
    %20 = vector.load %arg10[%c0_7, %c0_8] : memref<160x256xf32, #tpu.memory_space<vmem>>, vector<160x256xf32>
    tpu.vector_store %arg10[%c0_7, %c0_8], %19 {strides = array<i32>} : memref<160x256xf32, #tpu.memory_space<vmem>>, vector<160x256xf32>,
    return
  }
  func.func @transform_0(%arg0: i32, %arg1: i32) -> (i32, i32) {
    %c0_i32 = arith.constant 0 : i32
    %c0_i32_0 = arith.constant 0 : i32
    return %arg0, %c0_i32 : i32, i32
  }
  func.func @transform_1(%arg0: i32, %arg1: i32) -> (i32, i32) {
    %c0_i32 = arith.constant 0 : i32
    %c0_i32_0 = arith.constant 0 : i32
    return %arg0, %c0_i32 : i32, i32
  }
  func.func @transform_2(%arg0: i32, %arg1: i32) -> (i32, i32) {
    %c0_i32 = arith.constant 0 : i32
    %c0_i32_0 = arith.constant 0 : i32
    %c0_i32_1 = arith.constant 0 : i32
    return %c0_i32, %c0_i32_0 : i32, i32
  }
  func.func @transform_3(%arg0: i32, %arg1: i32) -> (i32, i32) {
    %c0_i32 = arith.constant 0 : i32
    %c0_i32_0 = arith.constant 0 : i32
    %c0_i32_1 = arith.constant 0 : i32
    return %c0_i32, %c0_i32_0 : i32, i32
  }
  func.func @transform_4(%arg0: i32, %arg1: i32) -> (i32, i32) {
    %c0_i32 = arith.constant 0 : i32
    %c0_i32_0 = arith.constant 0 : i32
    %c0_i32_1 = arith.constant 0 : i32
    return %c0_i32, %c0_i32_0 : i32, i32
  }
  func.func @transform_5(%arg0: i32, %arg1: i32) -> (i32, i32) {
    %c0_i32 = arith.constant 0 : i32
    %c0_i32_0 = arith.constant 0 : i32
    %c0_i32_1 = arith.constant 0 : i32
    return %c0_i32, %c0_i32_0 : i32, i32
  }
  func.func @transform_6(%arg0: i32, %arg1: i32) -> (i32, i32) {
    %c0_i32 = arith.constant 0 : i32
    %c0_i32_0 = arith.constant 0 : i32
    %c0_i32_1 = arith.constant 0 : i32
    return %c0_i32, %c0_i32_0 : i32, i32
  }
  func.func @transform_7(%arg0: i32, %arg1: i32) -> (i32, i32) {
    %c0_i32 = arith.constant 0 : i32
    %c0_i32_0 = arith.constant 0 : i32
    %c0_i32_1 = arith.constant 0 : i32
    return %c0_i32, %c0_i32_0 : i32, i32
  }
  func.func @transform_8(%arg0: i32, %arg1: i32) -> (i32, i32) {
    %c0_i32 = arith.constant 0 : i32
    return %arg0, %arg1 : i32, i32
  }
}

</mosaic_0001>

<bundles_post_ra>
// kernel: tpu_custom_call.1
= control target key start
LH: loop header
LB: loop body
LE: loop exit
PB: predicated region body
PF: predicated region fallthrough
CT: control target
= control target key end

     0   :  { %13 = vsyncpa [#allocation4], 0  ;;  %s3950_s0 = inlined_call_operand.vmem [shape: f32[320,16], index: 0, kind: input, shape index: {}]   ;;  %s3951_s1 = inlined_call_operand.vmem [shape: s32[320,1], index: 1, kind: input, shape index: {}]   ;;  %s3952_s2 = inlined_call_operand.vmem [shape: f32[16,128], index: 2, kind: input, shape index: {}]   ;;  %s3953_s3 = inlined_call_operand.vmem [shape: f32[3,128], index: 3, kind: input, shape index: {}]   ;;  %s3954_s4 = inlined_call_operand.vmem [shape: f32[128,128], index: 4, kind: input, shape index: {}]   ;;  %s3955_s5 = inlined_call_operand.vmem [shape: f32[3,128], index: 5, kind: input, shape index: {}]   ;;  %s3956_s6 = inlined_call_operand.vmem [shape: f32[128,256], index: 6, kind: input, shape index: {}]   ;;  %s3957_s7 = inlined_call_operand.vmem [shape: f32[1,256], index: 7, kind: input, shape index: {}]   ;;  %s3958_s8 = inlined_call_operand.hbm [shape: f32[320,256], index: 8, kind: output, shape index: {}]  }
   0x1   :  { %15 = vsyncpa [#allocation4 + $0x1], 0  ;;  %s2568_s27 = smov 0   ;;  %s2570_s28 = smov 0  }
   0x2   :  { %s2572_s29 = smov 0   ;;  %s2574_s30 = smov 0  }
   0x3   :  { %s2576_s9 = smov 0   ;;  %s2578_s10 = smov 0  }
   0x4 LB: > { %s2178_s11 = sadd.s32 4294967295, %s2518_s10   ;;  %s2179_s12 = sadd.s32 4294967294, %s2518_s10   ;;  %s2518_s10 = sphi %s2578_s10, %s21_s10   ;;  %s2514_s9 = sphi %s2576_s9, %s4017_s9   ;;  %s2510_s30 = sphi %s2574_s30, %s4016_s30   ;;  %s2506_s29 = sphi %s2572_s29, %s4015_s29   ;;  %s2502_s28 = sphi %s2570_s28, %s4014_s28   ;;  %s2498_s27 = sphi %s2568_s27, %s4013_s27  }
   0x5   : > { %s33_s13 = sadd.s32 1, %s2514_s9  ;;  %s220_s14 = sadd.s32 1, %s2506_s29 }
   0x6   : > { %p35_p0 = scmp.ge.s32.totalorder %s33_s13, 2  ;;  %p230_p1 = scmp.ne.s32.totalorder %s2506_s29, %s2502_s28 }
   0x7   : > { %p231_p2 = scmp.eq.s32.totalorder %s2178_s11, 1  ;;  %p236_p3 = scmp.ne.s32.totalorder %s2502_s28, %s2498_s27 }
   0x8   : > { %s4019_s13 = smov (%p35_p0, %s33_s13), 0  ;;  %p237_p5 = scmp.eq.s32.totalorder %s2179_s12, 1 }
   0x9   : > { %p2608_p4 = por %p231_p2, %p230_p1  ;;  %s215_s16 = ssub.s32 %s2514_s9, %s4019_s13 }
   0xa   : > { %p2182_p6 = scmp.ge.s32.totalorder %s2518_s10, 1  ;;  %p218_p7 = scmp.eq.s32.totalorder %s215_s16, 0 }
   0xb   : > { %p2615_p8 = por %p237_p5, %p236_p3  ;;  %p291_p9 = scmp.lt.s32.totalorder %s2518_s10, 3 }
   0xc   : > { %s2621_s18 = scalar_select %p218_p7, %s2506_s29, %s220_s14  }
   0xd   : > { %p292_p10 = pnand %p2182_p6, %p291_p9 }
   0xe   : > { %s330_s23 = smul.u32 (!%p292_p10), 20, %s2510_s30  ;;  %s327_s25 = sand.u32 (!%p292_p10), 1, %s2502_s28  }
   0xf   : > { %295 = sbr.rel (%p292_p10) target bundleno = 628 (0x274), region = 52  ;;  %s2072_s22 = scalar_lea.sflag (!%p292_p10), [#allocation4], %s327_s25 }
  0x10   : > { %p331_p11 = scmp.lt.s32.totalorder (!%p292_p10), %s330_s23, 39  ;;  %s3334_s26 = smul.u32 (!%p292_p10), 320, %s327_s25 }
  0x11   : > { %s2211_s14 = smul.u32 (!%p292_p10), 320, %s2510_s30 }
  0x12   : > { %s3353_s12 = scalar_lea.vmem (!%p292_p10), [#allocation3], %s3334_s26 }
  0x13   : > { %s2086_s20 = scalar_lea.hbm (!%p292_p10), %s3958_s8, %s2211_s14  ;;  %s2460_s14 = scalar_lea.hbm (!%p292_p10), %s3958_s8, 640 }
  0x14   : > { %v389_v0 = vld [vmem:[%s3952_s2 + $0x8] sm:$0xff]  ;;  %v388_v1 = vld [vmem:[%s3952_s2] sm:$0xff]  ;;  %v2520_v2 = vmov 0   ;;  %s4021_s23 = smov (!%p331_p11, %s330_s23), 39  ;;  %vm676_vm0 = vcmask 130048   ;;  %v869_v55 = vld [vmem:[%s3954_s4 + $0x78] sm:$0xff] }
  0x15   : > { %751 = vmatpush.msra.mxu0 %v389_v0  ;;  %2273 = vset.pattern.permute.xlu2 %v2520_v2  ;;  %s2183_s24 = sshll.u32 %s4021_s23, 3  ;;  %v868_v59 = vld [vmem:[%s3954_s4 + $0x70] sm:$0xff]  ;;  %v867_v60 = vld [vmem:[%s3954_s4 + $0x68] sm:$0xff]  ;;  %v866_v63 = vld [vmem:[%s3954_s4 + $0x60] sm:$0xff]  ;;  %s2089_s21 = sshll.u32 %s2086_s20, 4  ;;  %s2090_s21 = int_to_ptr.hbm [resolvable:$true] %s2089_s21 }
  0x16   : > { %2272 = vset.pattern.permute.xlu1 %v2520_v2  ;;  %2271 = vset.pattern.permute.xlu0 %v2520_v2  ;;  %s2636_s11 = scalar_lea.vmem %s3950_s0, %s2183_s24  ;;  %s2641_s16 = scalar_lea.vmem %s3951_s1, %s2183_s24 }
  0x17   : > { %752 = vmatpush.msra.mxu0 %v388_v1  ;;  %v348_v3 = vld [vmem:[%s2636_s11] sm:$0xff]  ;;  %v370_v4 = vld [vmem:[%s2641_s16 + $0x10] sm:$0xff]  ;;  %v369_v5 = vld [vmem:[%s2641_s16 + $0x8] sm:$0xff]  ;;  %916 = vmatpush.msra.mxu1 %v869_v55  ;;  %s2454_s23 = sshra.s32 %s2090_s21, 4  ;;  %s2455_s23 = int_to_ptr.hbm [resolvable:$true] %s2454_s23 }
  0x18   : > { %2185 = vmatmul.msk.f32.vlgmr.msra.gmra.mxu0 %vm676_vm0, %v348_v3  ;;  %vm393_vm1 = vcmp.eq.s32.totalorder %v370_v4, 1  ;;  %vm392_vm2 = vcmp.eq.s32.totalorder %v369_v5, 1  ;;  %v368_v6 = vld [vmem:[%s2641_s16] sm:$0xff]  ;;  %vm536_vm4 = vcmp.eq.s32.totalorder %v370_v4, 0  ;;  %vm535_vm5 = vcmp.eq.s32.totalorder %v369_v5, 0  ;;  %v349_v10 = vld [vmem:[%s2636_s11 + $0x8] sm:$0xff]  ;;  %p2461_p1 = scmp.lt.s32.totalorder %s2455_s23, %s3958_s8 }
  0x19   : > { %v414_v7 = vsel %vm393_vm1, 1, %v2520_v2  ;;  %v413_v8 = vsel %vm392_vm2, 1, %v2520_v2  ;;  %vm391_vm3 = vcmp.eq.s32.totalorder %v368_v6, 1  ;;  %vm534_vm6 = vcmp.eq.s32.totalorder %v368_v6, 0  ;;  %v372_v14 = vld [vmem:[%s2641_s16 + $0x20] sm:$0xff]  ;;  %v371_v15 = vld [vmem:[%s2641_s16 + $0x18] sm:$0xff]  ;;  %917 = vmatpush.msra.mxu1 %v868_v59 }
  0x1a   : > { %439 = vperm.xlu2 %2273, %v414_v7   ;;  %436 = vperm.xlu1 %2272, %v413_v8   ;;  %v412_v9 = vsel %vm391_vm3, 1, %v2520_v2  ;;  %v557_v11 = vsel %vm536_vm4, 1, %v2520_v2  ;;  %v556_v12 = vsel %vm535_vm5, 1, %v2520_v2  ;;  %v555_v13 = vsel %vm534_vm6, 1, %v2520_v2  ;;  %v350_v16 = vld [vmem:[%s2636_s11 + $0x10] sm:$0xff]  ;;  %v373_v20 = vld [vmem:[%s2641_s16 + $0x28] sm:$0xff] }
  0x1b   : > { %433 = vperm.xlu0 %2271, %v412_v9   ;;  %vm395_vm7 = vcmp.eq.s32.totalorder %v372_v14, 1  ;;  %vm537_vm8 = vcmp.eq.s32.totalorder %v371_v15, 0  ;;  %vm394_vm9 = vcmp.eq.s32.totalorder %v371_v15, 1  ;;  %vm539_vm10 = vcmp.eq.s32.totalorder %v373_v20, 0  ;;  %v351_v21 = vld [vmem:[%s2636_s11 + $0x18] sm:$0xff]  ;;  %v374_v26 = vld [vmem:[%s2641_s16 + $0x30] sm:$0xff]  ;;  %918 = vmatpush.msra.mxu1 %v867_v60 }
  0x1c   : > { %v416_v17 = vsel %vm395_vm7, 1, %v2520_v2  ;;  %v558_v18 = vsel %vm537_vm8, 1, %v2520_v2  ;;  %v415_v19 = vsel %vm394_vm9, 1, %v2520_v2  ;;  %vm396_vm11 = vcmp.eq.s32.totalorder %v373_v20, 1  ;;  %v375_v25 = vld [vmem:[%s2641_s16 + $0x38] sm:$0xff]  ;;  %v352_v27 = vld [vmem:[%s2636_s11 + $0x20] sm:$0xff] }
  0x1d   : > { %vm538_vm12 = vcmp.eq.s32.totalorder %v372_v14, 0  ;;  %v560_v22 = vsel %vm539_vm10, 1, %v2520_v2  ;;  %v417_v23 = vsel %vm396_vm11, 1, %v2520_v2  ;;  %vm398_vm13 = vcmp.eq.s32.totalorder %v375_v25, 1  ;;  %v376_v31 = vld [vmem:[%s2641_s16 + $0x40] sm:$0xff]  ;;  %v353_v32 = vld [vmem:[%s2636_s11 + $0x28] sm:$0xff]  ;;  %919 = vmatpush.msra.mxu1 %v866_v63 }
  0x1e   : > { %v559_v24 = vsel %vm538_vm12, 1, %v2520_v2  ;;  %vm540_vm14 = vcmp.eq.s32.totalorder %v374_v26, 0  ;;  %vm397_vm15 = vcmp.eq.s32.totalorder %v374_v26, 1  ;;  %v419_v28 = vsel %vm398_vm13, 1, %v2520_v2  ;;  %v378_v36 = vld [vmem:[%s2641_s16 + $0x50] sm:$0xff]  ;;  %v377_v37 = vld [vmem:[%s2641_s16 + $0x48] sm:$0xff] }
  0x1f   : > { %v561_v29 = vsel %vm540_vm14, 1, %v2520_v2  ;;  %v418_v30 = vsel %vm397_vm15, 1, %v2520_v2  ;;  %vm542_vm1 = vcmp.eq.s32.totalorder %v376_v31, 0  ;;  %vm399_vm2 = vcmp.eq.s32.totalorder %v376_v31, 1  ;;  %v354_v38 = vld [vmem:[%s2636_s11 + $0x30] sm:$0xff]  ;;  %v379_v42 = vld [vmem:[%s2641_s16 + $0x58] sm:$0xff] }
  0x20   : > { %2186 = vmatmul.msk.f32.gmra.mxu0 %vm676_vm0, %v349_v10  ;;  %vm541_vm3 = vcmp.eq.s32.totalorder %v375_v25, 0  ;;  %v563_v33 = vsel %vm542_vm1, 1, %v2520_v2  ;;  %v420_v34 = vsel %vm399_vm2, 1, %v2520_v2  ;;  %vm401_vm4 = vcmp.eq.s32.totalorder %v378_v36, 1  ;;  %v355_v43 = vld [vmem:[%s2636_s11 + $0x38] sm:$0xff]  ;;  %v381_v47 = vld [vmem:[%s2641_s16 + $0x68] sm:$0xff] }
  0x21   : > { %v562_v35 = vsel %vm541_vm3, 1, %v2520_v2  ;;  %vm543_vm5 = vcmp.eq.s32.totalorder %v377_v37, 0  ;;  %vm400_vm6 = vcmp.eq.s32.totalorder %v377_v37, 1  ;;  %v422_v39 = vsel %vm401_vm4, 1, %v2520_v2  ;;  %v380_v48 = vld [vmem:[%s2641_s16 + $0x60] sm:$0xff]  ;;  %v382_v53 = vld [vmem:[%s2641_s16 + $0x70] sm:$0xff] }
  0x22   : > { %582 = vperm.xlu2 %2273, %v557_v11   ;;  %579 = vperm.xlu1 %2272, %v556_v12   ;;  %v564_v40 = vsel %vm543_vm5, 1, %v2520_v2  ;;  %v421_v41 = vsel %vm400_vm6, 1, %v2520_v2  ;;  %vm545_vm7 = vcmp.eq.s32.totalorder %v379_v42, 0  ;;  %vm402_vm8 = vcmp.eq.s32.totalorder %v379_v42, 1  ;;  %v356_v49 = vld [vmem:[%s2636_s11 + $0x40] sm:$0xff]  ;;  %v357_v54 = vld [vmem:[%s2636_s11 + $0x48] sm:$0xff] }
  0x23   : > { %576 = vperm.xlu0 %2271, %v555_v13   ;;  %vm544_vm9 = vcmp.eq.s32.totalorder %v378_v36, 0  ;;  %v566_v44 = vsel %vm545_vm7, 1, %v2520_v2  ;;  %v423_v45 = vsel %vm402_vm8, 1, %v2520_v2  ;;  %vm404_vm10 = vcmp.eq.s32.totalorder %v381_v47, 1  ;;  %v384_v61 = vld [vmem:[%s2641_s16 + $0x80] sm:$0xff]  ;;  %v383_v62 = vld [vmem:[%s2641_s16 + $0x78] sm:$0xff] }
  0x24   : > { %v565_v46 = vsel %vm544_vm9, 1, %v2520_v2  ;;  %vm546_vm11 = vcmp.eq.s32.totalorder %v380_v48, 0  ;;  %vm403_vm12 = vcmp.eq.s32.totalorder %v380_v48, 1  ;;  %v425_v50 = vsel %vm404_vm10, 1, %v2520_v2  ;;  %v358_v0 = vld [vmem:[%s2636_s11 + $0x50] sm:$0xff]  ;;  %v865_v1 = vld [vmem:[%s3954_s4 + $0x58] sm:$0xff] }
  0x25   : > { %v567_v51 = vsel %vm546_vm11, 1, %v2520_v2  ;;  %v424_v52 = vsel %vm403_vm12, 1, %v2520_v2  ;;  %vm548_vm13 = vcmp.eq.s32.totalorder %v382_v53, 0  ;;  %vm405_vm14 = vcmp.eq.s32.totalorder %v382_v53, 1  ;;  %920 = vmatpush.msra.mxu1 %v865_v1  ;;  %v864_v6 = vld [vmem:[%s3954_s4 + $0x50] sm:$0xff]  ;;  %v863_v7 = vld [vmem:[%s3954_s4 + $0x48] sm:$0xff] }
  0x26   : > { %vm547_vm15 = vcmp.eq.s32.totalorder %v381_v47, 0  ;;  %v569_v56 = vsel %vm548_vm13, 1, %v2520_v2  ;;  %v426_v57 = vsel %vm405_vm14, 1, %v2520_v2  ;;  %vm407_vm1 = vcmp.eq.s32.totalorder %v384_v61, 1  ;;  %v385_v8 = vld [vmem:[%s2641_s16 + $0x88] sm:$0xff]  ;;  %v862_v9 = vld [vmem:[%s3954_s4 + $0x40] sm:$0xff] }
  0x27   : > { %v568_v58 = vsel %vm547_vm15, 1, %v2520_v2  ;;  %vm549_vm2 = vcmp.eq.s32.totalorder %v383_v62, 0  ;;  %vm406_vm3 = vcmp.eq.s32.totalorder %v383_v62, 1  ;;  %v428_v3 = vsel %vm407_vm1, 1, %v2520_v2  ;;  %921 = vmatpush.msra.mxu1 %v864_v6  ;;  %v359_v10 = vld [vmem:[%s2636_s11 + $0x58] sm:$0xff]  ;;  %v860_v15 = vld [vmem:[%s3954_s4 + $0x30] sm:$0xff] }
  0x28   : > { %2187 = vmatmul.msk.f32.gmra.mxu0 %vm676_vm0, %v350_v16  ;;  %v570_v4 = vsel %vm549_vm2, 1, %v2520_v2  ;;  %v427_v5 = vsel %vm406_vm3, 1, %v2520_v2  ;;  %vm551_vm4 = vcmp.eq.s32.totalorder %v385_v8, 0  ;;  %vm408_vm5 = vcmp.eq.s32.totalorder %v385_v8, 1  ;;  %v861_v11 = vld [vmem:[%s3954_s4 + $0x38] sm:$0xff]  ;;  %v859_v16 = vld [vmem:[%s3954_s4 + $0x28] sm:$0xff] }
  0x29   : > { %922 = vmatpush.msra.mxu1 %v863_v7  ;;  %vm550_vm6 = vcmp.eq.s32.totalorder %v384_v61, 0  ;;  %v572_v12 = vsel %vm551_vm4, 1, %v2520_v2  ;;  %v429_v13 = vsel %vm408_vm5, 1, %v2520_v2  ;;  %v856_v26 = vld [vmem:[%s3954_s4 + $0x10] sm:$0xff]  ;;  %v2823_v42 = vld [vmem:[%s3953_s3 + $0x2] ss:$0 sm:$0xff] }
  0x2a   : > { %445 = vperm.xlu2 %2273, %v416_v17   ;;  %585 = vperm.xlu1 %2272, %v558_v18   ;;  %v571_v14 = vsel %vm550_vm6, 1, %v2520_v2  ;;  %v387_v17 = vld [vmem:[%s2641_s16 + $0x98] sm:$0xff]  ;;  %v386_v18 = vld [vmem:[%s2641_s16 + $0x90] sm:$0xff]  ;;  %s2456_s24 = scalar_lea.hbm %s2455_s23, 320 }
  0x2b   : > { %442 = vperm.xlu0 %2271, %v415_v19   ;;  %923 = vmatpush.msra.mxu1 %v862_v9  ;;  %v858_v19 = vld [vmem:[%s3954_s4 + $0x20] sm:$0xff]  ;;  %vm410_vm7 = vcmp.eq.s32.totalorder %v387_v17, 1  ;;  %vm552_vm8 = vcmp.eq.s32.totalorder %v386_v18, 0  ;;  %vm409_vm9 = vcmp.eq.s32.totalorder %v386_v18, 1  ;;  %vm553_vm12 = vcmp.eq.s32.totalorder %v387_v17, 0  ;;  %v362_v37 = vld [vmem:[%s2636_s11 + $0x70] sm:$0xff]  ;;  %p2457_p12 = scmp.ne.s32.totalorder %s2455_s23, %s2456_s24  ;;  %p2462_p2 = scmp.lt.s32.totalorder %s2460_s14, %s2456_s24 }
  0x2c   : > { %v430_v25 = vsel %vm409_vm9, 1, %v2520_v2 }
  0x2d   : > { %924 = vmatpush.msra.mxu1 %v861_v11  ;;  %v366_v11 = vld [vmem:[%s2636_s11 + $0x90] sm:$0xff]  ;;  %p2458_p13 = pnand %p2457_p12, %p2608_p4  ;;  %p2463_p3 = por %p2462_p2, %p2461_p1 }
  0x2f   : > { %925 = vmatpush.msra.mxu1 %v860_v15  ;;  %p2459_p0 = pneg %p2458_p13 }
  0x30   : > { %2188 = vmatmul.msk.f32.gmra.mxu0 %vm676_vm0, %v351_v21  ;;  %v360_v21 = vld [vmem:[%s2636_s11 + $0x60] sm:$0xff] }
  0x31   : > { %926 = vmatpush.msra.mxu1 %v859_v16  ;;  %p2464_p5 = pnand %p2463_p3, %p2459_p0 }
  0x32   : > { %591 = vperm.xlu2 %2273, %v560_v22   ;;  %448 = vperm.xlu1 %2272, %v417_v23   ;;  %v857_v22 = vld [vmem:[%s3954_s4 + $0x18] sm:$0xff]  ;;  %v431_v23 = vsel %vm410_vm7, 1, %v2520_v2 }
  0x33   : > { %588 = vperm.xlu0 %2271, %v559_v24   ;;  %927 = vmatpush.msra.mxu1 %v858_v19  ;;  %v573_v24 = vsel %vm552_vm8, 1, %v2520_v2 }
  0x35   : > { %928 = vmatpush.msra.mxu1 %v857_v22 }
  0x37   : > { %929 = vmatpush.msra.mxu1 %v856_v26  ;;  %v367_v26 = vld [vmem:[%s2636_s11 + $0x98] sm:$0xff] }
  0x38   : > { %2189 = vmatmul.msk.f32.gmra.mxu0 %vm676_vm0, %v352_v27  ;;  %v855_v27 = vld [vmem:[%s3954_s4 + $0x8] sm:$0xff] }
  0x39   : > { %930 = vmatpush.msra.mxu1 %v855_v27 }
  0x3a   : > { %454 = vperm.xlu2 %2273, %v419_v28   ;;  %594 = vperm.xlu1 %2272, %v561_v29   ;;  %v854_v28 = vld [vmem:[%s3954_s4] sm:$0xff] }
  0x3b   : > { %451 = vperm.xlu0 %2271, %v418_v30   ;;  %v2782_v29 = vld [vmem:[%s3955_s5 + $0x1] ss:$0 sm:$0xff]  ;;  %v2787_v30 = vld [vmem:[%s3955_s5 + $0x2] ss:$0 sm:$0xff]  ;;  %931 = vmatpush.msra.mxu1 %v854_v28 }
  0x40   : > { %2190 = vmatmul.msk.f32.gmra.mxu0 %vm676_vm0, %v353_v32 }
  0x42   : > { %600 = vperm.xlu2 %2273, %v563_v33   ;;  %457 = vperm.xlu1 %2272, %v420_v34   ;;  %v361_v33 = vld [vmem:[%s2636_s11 + $0x68] sm:$0xff]  ;;  %v2800_v34 = vld [vmem:[%s3955_s5] ss:$0 sm:$0xff] }
  0x43   : > { %597 = vperm.xlu0 %2271, %v562_v35   ;;  %v574_v35 = vsel %vm553_vm12, 1, %v2520_v2  ;;  %v2818_v2 = vld [vmem:[%s3953_s3 + $0x1] ss:$0 sm:$0xff] }
  0x48   : > { %2191 = vmatmul.msk.f32.gmra.mxu0 %vm676_vm0, %v354_v38 }
  0x4a   : > { %463 = vperm.xlu2 %2273, %v422_v39   ;;  %603 = vperm.xlu1 %2272, %v564_v40  }
  0x4b   : > { %460 = vperm.xlu0 %2271, %v421_v41   ;;  %v363_v41 = vld [vmem:[%s2636_s11 + $0x78] sm:$0xff] }
  0x50   : > { %2192 = vmatmul.msk.f32.gmra.mxu0 %vm676_vm0, %v355_v43 }
  0x52   : > { %609 = vperm.xlu2 %2273, %v566_v44   ;;  %466 = vperm.xlu1 %2272, %v423_v45   ;;  %v2830_v44 = vld [vmem:[%s3953_s3] ss:$0 sm:$0xff] }
  0x53   : > { %606 = vperm.xlu0 %2271, %v565_v46  }
  0x58   : > { %2193 = vmatmul.msk.f32.gmra.mxu0 %vm676_vm0, %v356_v49  ;;  %v364_v49 = vld [vmem:[%s2636_s11 + $0x80] sm:$0xff] }
  0x5a   : > { %472 = vperm.xlu2 %2273, %v425_v50   ;;  %612 = vperm.xlu1 %2272, %v567_v51  }
  0x5b   : > { %469 = vperm.xlu0 %2271, %v424_v52  }
  0x60   : > { %2194 = vmatmul.msk.f32.gmra.mxu0 %vm676_vm0, %v357_v54 }
  0x62   : > { %618 = vperm.xlu2 %2273, %v569_v56   ;;  %475 = vperm.xlu1 %2272, %v426_v57  }
  0x63   : > { %615 = vperm.xlu0 %2271, %v568_v58  }
  0x68   : > { %2195 = vmatmul.msk.f32.gmra.mxu0 %vm676_vm0, %v358_v0  ;;  %v365_v0 = vld [vmem:[%s2636_s11 + $0x88] sm:$0xff]  ;;  %s2087_s11 = sshll.u32 %s3353_s12, 4  ;;  %s2088_s11 = int_to_ptr.vmem [resolvable:$true] %s2087_s11 }
  0x6a   : > { %481 = vperm.xlu2 %2273, %v428_v3   ;;  %621 = vperm.xlu1 %2272, %v570_v4  }
  0x6b   : > { %478 = vperm.xlu0 %2271, %v427_v5  }
  0x70   : > { %2196 = vmatmul.msk.f32.gmra.mxu0 %vm676_vm0, %v359_v10 }
  0x72   : > { %627 = vperm.xlu2 %2273, %v572_v12   ;;  %484 = vperm.xlu1 %2272, %v429_v13  }
  0x73   : > { %624 = vperm.xlu0 %2271, %v571_v14  }
  0x74   : > { %v2759_v20 = vpop.permute.xlu2 %439 }
  0x75   : > { %vm494_vm10 = vcmp.eq.s32.totalorder %v2759_v20, 1 }
  0x76   : > { %v876_v32 = vsel %vm494_vm10, %v2782_v29, %v2787_v30  ;;  %v516_v7 = vsel %vm494_vm10, %v2818_v2, %v2823_v42 }
  0x78   : > { %2197 = vmatmul.msk.f32.gmra.mxu0 %vm676_vm0, %v360_v21 }
  0x7a   : > { %490 = vperm.xlu2 %2273, %v431_v23   ;;  %630 = vperm.xlu1 %2272, %v573_v24  }
  0x7b   : > { %487 = vperm.xlu0 %2271, %v430_v25  }
  0x7c   : > { %v2789_v31 = vpop.permute.xlu2 %582 }
  0x7d   : > { %vm637_vm11 = vcmp.eq.s32.totalorder %v2789_v31, 1 }
  0x7e   : > { %v2807_v36 = vsel %vm637_vm11, %v2800_v34, %v876_v32  ;;  %v658_v14 = vsel %vm637_vm11, %v2830_v44, %v516_v7 }
  0x80   : > { %2198 = vmatmul.msk.f32.gmra.mxu0 %vm676_vm0, %v361_v33 }
  0x83   : > { %633 = vperm.xlu0 %2271, %v574_v35  }
  0x84   : > { %v2810_v38 = vpop.permute.xlu2 %445 }
  0x85   : > { %vm496_vm4 = vcmp.eq.s32.totalorder %v2810_v38, 1 }
  0x86   : > { %v878_v15 = vsel %vm496_vm4, %v2782_v29, %v2787_v30 }
  0x88   : > { %2199 = vmatmul.msk.f32.gmra.mxu0 %vm676_vm0, %v362_v37 }
  0x8c   : > { %v437_v39 = vpop.permute.xlu1 %436  ;;  %v2825_v43 = vpop.permute.xlu2 %591 }
  0x8d   : > { %v434_v40 = vpop.permute.xlu0 %433  ;;  %vm493_vm13 = vcmp.eq.s32.totalorder %v437_v39, 1  ;;  %vm640_vm6 = vcmp.eq.s32.totalorder %v2825_v43, 1  ;;  %v518_v39 = vsel %vm496_vm4, %v2818_v2, %v2823_v42 }
  0x8e   : > { %vm492_vm14 = vcmp.eq.s32.totalorder %v434_v40, 1  ;;  %v875_v45 = vsel %vm493_vm13, %v2782_v29, %v2787_v30  ;;  %v515_v56 = vsel %vm493_vm13, %v2818_v2, %v2823_v42 }
  0x8f   : > { %v514_v50 = vsel %vm492_vm14, %v2818_v2, %v2823_v42  ;;  %v874_v51 = vsel %vm492_vm14, %v2782_v29, %v2787_v30 }
  0x90   : > { %2200 = vmatmul.msk.f32.gmra.mxu0 %vm676_vm0, %v363_v41 }
  0x94   : > { %v580_v46 = vpop.permute.xlu1 %579  ;;  %v2852_v58 = vpop.permute.xlu2 %454 }
  0x95   : > { %vm636_vm15 = vcmp.eq.s32.totalorder %v580_v46, 1  ;;  %v577_v47 = vpop.permute.xlu0 %576  ;;  %v754_v48 = vpop.f32.mrf.mxu0  ;;  %vm499_vm10 = vcmp.eq.s32.totalorder %v2852_v58, 1 }
  0x96   : > { %vm635_vm1 = vcmp.eq.s32.totalorder %v577_v47, 1  ;;  %v2846_v54 = vsel %vm636_vm15, %v2800_v34, %v875_v45  ;;  %v657_v62 = vsel %vm636_vm15, %v2830_v44, %v515_v56  ;;  %v881_v38 = vsel %vm499_vm10, %v2782_v29, %v2787_v30 }
  0x97   : > { %v656_v52 = vsel %vm635_vm1, %v2830_v44, %v514_v50  ;;  %v2842_v53 = vsel %vm635_vm1, %v2800_v34, %v874_v51 }
  0x98   : > { %v755_v55 = vadd.f32 %v754_v48, %v656_v52  ;;  %2201 = vmatmul.msk.f32.gmra.mxu0 %vm676_vm0, %v364_v49 }
  0x9a   : > { %v814_v57 = vmul.f32 0.01, %v755_v55 }
  0x9c   : > { %v586_v59 = vpop.permute.xlu1 %585  ;;  %v834_v60 = vmax.f32 %v755_v55, %v814_v57  ;;  %v2872_v12 = vpop.permute.xlu2 %600 }
  0x9d   : > { %vm638_vm2 = vcmp.eq.s32.totalorder %v586_v59, 1  ;;  %v443_v61 = vpop.permute.xlu0 %442  ;;  %v757_v63 = vpop.f32.mrf.mxu0 }
  0x9e   : > { %vm495_vm3 = vcmp.eq.s32.totalorder %v443_v61, 1  ;;  %v758_v1 = vadd.f32 %v757_v63, %v657_v62  ;;  %932 = vmatmul.f32.vlgmr.msra.gmra.mxu1 %v834_v60 }
  0x9f   : > { %v877_v3 = vsel %vm495_vm3, %v2782_v29, %v2787_v30  ;;  %v517_v20 = vsel %vm495_vm3, %v2818_v2, %v2823_v42 }
  0xa0   : > { %v815_v4 = vmul.f32 0.01, %v758_v1  ;;  %2202 = vmatmul.msk.f32.gmra.mxu0 %vm676_vm0, %v365_v0  ;;  %v2863_v5 = vsel %vm638_vm2, %v2800_v34, %v877_v3  ;;  %v659_v24 = vsel %vm638_vm2, %v2830_v44, %v517_v20 }
  0xa2   : > { %v835_v6 = vmax.f32 %v758_v1, %v815_v4 }
  0xa4   : > { %v449_v8 = vpop.permute.xlu1 %448  ;;  %v2903_v31 = vpop.permute.xlu2 %463 }
  0xa5   : > { %vm497_vm5 = vcmp.eq.s32.totalorder %v449_v8, 1  ;;  %v589_v9 = vpop.permute.xlu0 %588  ;;  %v760_v10 = vpop.f32.mrf.mxu0  ;;  %vm502_vm15 = vcmp.eq.s32.totalorder %v2903_v31, 1 }
  0xa6   : > { %v879_v13 = vsel %vm497_vm5, %v2782_v29, %v2787_v30  ;;  %935 = vmatmul.f32.gmra.mxu1 %v835_v6  ;;  %vm639_vm7 = vcmp.eq.s32.totalorder %v589_v9, 1  ;;  %v761_v16 = vadd.f32 %v760_v10, %v658_v14  ;;  %v519_v51 = vsel %vm497_vm5, %v2818_v2, %v2823_v42 }
  0xa7   : > { %v2887_v17 = vsel %vm640_vm6, %v2800_v34, %v879_v13  ;;  %v2892_v18 = vsel %vm639_vm7, %v2800_v34, %v878_v15  ;;  %v660_v46 = vsel %vm639_vm7, %v2830_v44, %v518_v39  ;;  %v661_v59 = vsel %vm640_vm6, %v2830_v44, %v519_v51 }
  0xa8   : > { %2203 = vmatmul.msk.f32.gmra.mxu0 %vm676_vm0, %v366_v11  ;;  %v816_v19 = vmul.f32 0.01, %v761_v16  ;;  %v884_v10 = vsel %vm502_vm15, %v2782_v29, %v2787_v30 }
  0xaa   : > { %v836_v21 = vmax.f32 %v761_v16, %v816_v19  ;;  %v521_v19 = vsel %vm499_vm10, %v2818_v2, %v2823_v42 }
  0xac   : > { %v595_v22 = vpop.permute.xlu1 %594  ;;  %v2941_v52 = vpop.permute.xlu2 %609 }
  0xad   : > { %vm641_vm8 = vcmp.eq.s32.totalorder %v595_v22, 1  ;;  %v452_v23 = vpop.permute.xlu0 %451  ;;  %v763_v25 = vpop.f32.mrf.mxu0  ;;  %vm646_vm2 = vcmp.eq.s32.totalorder %v2941_v52, 1  ;;  %v1097_v52 = vld [vmem:[%s3956_s6 + $0x98] sm:$0xff] }
  0xae   : > { %vm498_vm9 = vcmp.eq.s32.totalorder %v452_v23, 1  ;;  %v764_v27 = vadd.f32 %v763_v25, %v659_v24  ;;  %938 = vmatmul.f32.gmra.mxu1 %v836_v21 }
  0xaf   : > { %v880_v28 = vsel %vm498_vm9, %v2782_v29, %v2787_v30  ;;  %v520_v43 = vsel %vm498_vm9, %v2818_v2, %v2823_v42 }
  0xb0   : > { %v817_v32 = vmul.f32 0.01, %v764_v27  ;;  %2204 = vmatmul.msk.f32.gmra.mxu0 %vm676_vm0, %v367_v26  ;;  %v2908_v33 = vsel %vm641_vm8, %v2800_v34, %v880_v28  ;;  %vm643_vm0 = vcmp.eq.s32.totalorder %v2872_v12, 1  ;;  %v662_v9 = vsel %vm641_vm8, %v2830_v44, %v520_v43  ;;  %v1108_v43 = vld [vmem:[%s3956_s6 + $0xf0] sm:$0xff] }
  0xb1   : > { %1117 = vmatpush.msra.mxu2 %v1108_v43 }
  0xb2   : > { %v837_v35 = vmax.f32 %v764_v27, %v817_v32 }
  0xb4   : > { %v2911_v37 = vpop.permute.xlu1 %457  ;;  %v2961_v3 = vpop.permute.xlu2 %472 }
  0xb5   : > { %vm500_vm11 = vcmp.eq.s32.totalorder %v2911_v37, 1  ;;  %v598_v40 = vpop.permute.xlu0 %597  ;;  %v766_v41 = vpop.f32.mrf.mxu0  ;;  %vm505_vm6 = vcmp.eq.s32.totalorder %v2961_v3, 1  ;;  %v1080_v3 = vld [vmem:[%s3956_s6 + $0x10] sm:$0xff] }
  0xb6   : > { %v882_v45 = vsel %vm500_vm11, %v2782_v29, %v2787_v30  ;;  %941 = vmatmul.f32.gmra.mxu1 %v837_v35  ;;  %vm642_vm12 = vcmp.eq.s32.totalorder %v598_v40, 1  ;;  %v767_v47 = vadd.f32 %v766_v41, %v660_v46  ;;  %v522_v32 = vsel %vm500_vm11, %v2818_v2, %v2823_v42 }
  0xb7   : > { %v2932_v48 = vsel %vm643_vm0, %v2800_v34, %v882_v45  ;;  %v2936_v49 = vsel %vm642_vm12, %v2800_v34, %v881_v38  ;;  %v663_v22 = vsel %vm642_vm12, %v2830_v44, %v521_v19  ;;  %v664_v37 = vsel %vm643_vm0, %v2830_v44, %v522_v32 }
  0xb8   : > { %v818_v50 = vmul.f32 0.01, %v767_v47  ;;  %v887_v45 = vsel %vm505_vm6, %v2782_v29, %v2787_v30 }
  0xba   : > { %v838_v55 = vmax.f32 %v767_v47, %v818_v50 }
  0xbc   : > { %v2943_v56 = vpop.permute.xlu1 %603  ;;  %v3002_v25 = vpop.permute.xlu2 %618 }
  0xbd   : > { %vm644_vm13 = vcmp.eq.s32.totalorder %v2943_v56, 1  ;;  %v461_v57 = vpop.permute.xlu0 %460  ;;  %v769_v60 = vpop.f32.mrf.mxu0  ;;  %vm649_vm8 = vcmp.eq.s32.totalorder %v3002_v25, 1  ;;  %v1109_v56 = vld [vmem:[%s3956_s6 + $0xf8] sm:$0xff] }
  0xbe   : > { %vm501_vm14 = vcmp.eq.s32.totalorder %v461_v57, 1  ;;  %v770_v61 = vadd.f32 %v769_v60, %v661_v59  ;;  %944 = vmatmul.f32.gmra.mxu1 %v838_v55  ;;  %1194 = vmatpush.msra.mxu3 %v1109_v56  ;;  %v1096_v56 = vld [vmem:[%s3956_s6 + $0x90] sm:$0xff] }
  0xbf   : > { %v883_v62 = vsel %vm501_vm14, %v2782_v29, %v2787_v30  ;;  %v523_v51 = vsel %vm501_vm14, %v2818_v2, %v2823_v42 }
  0xc0   : > { %v819_v63 = vmul.f32 0.01, %v770_v61  ;;  %v2955_v0 = vsel %vm644_vm13, %v2800_v34, %v883_v62 }
  0xc2   : > { %v839_v1 = vmax.f32 %v770_v61, %v819_v63  ;;  %v665_v61 = vsel %vm644_vm13, %v2830_v44, %v523_v51 }
  0xc4   : > { %v2963_v4 = vpop.permute.xlu1 %466  ;;  %v3046_v12 = vpop.permute.xlu2 %481 }
  0xc5   : > { %vm503_vm1 = vcmp.eq.s32.totalorder %v2963_v4, 1  ;;  %v2966_v6 = vpop.permute.xlu0 %606  ;;  %v772_v7 = vpop.f32.mrf.mxu0  ;;  %vm508_vm0 = vcmp.eq.s32.totalorder %v3046_v12, 1 }
  0xc6   : > { %v885_v8 = vsel %vm503_vm1, %v2782_v29, %v2787_v30  ;;  %947 = vmatmul.f32.gmra.mxu1 %v839_v1  ;;  %vm645_vm3 = vcmp.eq.s32.totalorder %v2966_v6, 1  ;;  %v773_v11 = vadd.f32 %v772_v7, %v662_v9  ;;  %v1106_v7 = vld [vmem:[%s3956_s6 + $0xe0] sm:$0xff]  ;;  %v1107_v9 = vld [vmem:[%s3956_s6 + $0xe8] sm:$0xff]  ;;  %v890_v19 = vsel %vm508_vm0, %v2782_v29, %v2787_v30  ;;  %v1105_v6 = vld [vmem:[%s3956_s6 + $0xd8] sm:$0xff] }
  0xc7   : > { %v2983_v13 = vsel %vm646_vm2, %v2800_v34, %v885_v8  ;;  %v2988_v14 = vsel %vm645_vm3, %v2800_v34, %v884_v10  ;;  %1118 = vmatpush.msra.mxu2 %v1106_v7  ;;  %1195 = vmatpush.msra.mxu3 %v1107_v9 }
  0xc8   : > { %v820_v15 = vmul.f32 0.01, %v773_v11 }
  0xc9   : > { %1196 = vmatpush.msra.mxu3 %v1105_v6  ;;  %v1091_v6 = vld [vmem:[%s3956_s6 + $0x68] sm:$0xff] }
  0xca   : > { %v840_v16 = vmax.f32 %v773_v11, %v820_v15  ;;  %v524_v15 = vsel %vm502_vm15, %v2818_v2, %v2823_v42 }
  0xcc   : > { %v2994_v20 = vpop.permute.xlu1 %612  ;;  %v3082_v11 = vpop.permute.xlu2 %627 }
  0xcd   : > { %vm647_vm4 = vcmp.eq.s32.totalorder %v2994_v20, 1  ;;  %v2997_v21 = vpop.permute.xlu0 %469  ;;  %v775_v23 = vpop.f32.mrf.mxu0  ;;  %vm652_vm13 = vcmp.eq.s32.totalorder %v3082_v11, 1  ;;  %v1089_v20 = vld [vmem:[%s3956_s6 + $0x58] sm:$0xff] }
  0xce   : > { %vm504_vm5 = vcmp.eq.s32.totalorder %v2997_v21, 1  ;;  %v776_v24 = vadd.f32 %v775_v23, %v663_v22  ;;  %950 = vmatmul.f32.gmra.mxu1 %v840_v16  ;;  %v666_v23 = vsel %vm645_vm3, %v2830_v44, %v524_v15  ;;  %v1095_v15 = vld [vmem:[%s3956_s6 + $0x88] sm:$0xff] }
  0xcf   : > { %v886_v58 = vsel %vm504_vm5, %v2782_v29, %v2787_v30 }
  0xd0   : > { %v821_v26 = vmul.f32 0.01, %v776_v24  ;;  %v3011_v27 = vsel %vm647_vm4, %v2800_v34, %v886_v58 }
  0xd2   : > { %v841_v28 = vmax.f32 %v776_v24, %v821_v26  ;;  %v1104_v26 = vld [vmem:[%s3956_s6 + $0xd0] sm:$0xff] }
  0xd3   : > { %1119 = vmatpush.msra.mxu2 %v1104_v26  ;;  %v1090_v26 = vld [vmem:[%s3956_s6 + $0x60] sm:$0xff] }
  0xd4   : > { %v3018_v35 = vpop.permute.xlu1 %475  ;;  %v3163_v7 = vpop.permute.xlu2 %490 }
  0xd5   : > { %vm506_vm7 = vcmp.eq.s32.totalorder %v3018_v35, 1  ;;  %v3021_v39 = vpop.permute.xlu0 %615  ;;  %v778_v40 = vpop.f32.mrf.mxu0 }
  0xd6   : > { %v888_v41 = vsel %vm506_vm7, %v2782_v29, %v2787_v30  ;;  %953 = vmatmul.f32.gmra.mxu1 %v841_v28  ;;  %vm648_vm9 = vcmp.eq.s32.totalorder %v3021_v39, 1  ;;  %v779_v46 = vadd.f32 %v778_v40, %v664_v37  ;;  %v1103_v37 = vld [vmem:[%s3956_s6 + $0xc8] sm:$0xff]  ;;  %v1081_v39 = vld [vmem:[%s3956_s6 + $0x18] sm:$0xff] }
  0xd7   : > { %v3039_v38 = vsel %vm649_vm8, %v2800_v34, %v888_v41  ;;  %v3044_v47 = vsel %vm648_vm9, %v2800_v34, %v887_v45  ;;  %v1102_v41 = vld [vmem:[%s3956_s6 + $0xc0] sm:$0xff]  ;;  %v1100_v45 = vld [vmem:[%s3956_s6 + $0xb0] sm:$0xff]  ;;  %1197 = vmatpush.msra.mxu3 %v1103_v37 }
  0xd8   : > { %v822_v50 = vmul.f32 0.01, %v779_v46  ;;  %1120 = vmatpush.msra.mxu2 %v1102_v41 }
  0xda   : > { %v842_v55 = vmax.f32 %v779_v46, %v822_v50  ;;  %v1101_v46 = vld [vmem:[%s3956_s6 + $0xb8] sm:$0xff]  ;;  %v525_v50 = vsel %vm503_vm1, %v2818_v2, %v2823_v42  ;;  %1121 = vmatpush.msra.mxu2 %v1100_v45 }
  0xdb   : > { %1198 = vmatpush.msra.mxu3 %v1101_v46  ;;  %v667_v4 = vsel %vm646_vm2, %v2830_v44, %v525_v50  ;;  %vm511_vm2 = vcmp.eq.s32.totalorder %v3163_v7, 1  ;;  %v1088_v46 = vld [vmem:[%s3956_s6 + $0x50] sm:$0xff] }
  0xdc   : > { %v3051_v59 = vpop.permute.xlu1 %621  ;;  %v893_v37 = vsel %vm511_vm2, %v2782_v29, %v2787_v30 }
  0xdd   : > { %vm650_vm10 = vcmp.eq.s32.totalorder %v3051_v59, 1  ;;  %v3054_v60 = vpop.permute.xlu0 %478  ;;  %v781_v62 = vpop.f32.mrf.mxu0 }
  0xde   : > { %vm507_vm11 = vcmp.eq.s32.totalorder %v3054_v60, 1  ;;  %v782_v63 = vadd.f32 %v781_v62, %v665_v61  ;;  %956 = vmatmul.f32.gmra.mxu1 %v842_v55  ;;  %v1098_v55 = vld [vmem:[%s3956_s6 + $0xa0] sm:$0xff]  ;;  %v1099_v62 = vld [vmem:[%s3956_s6 + $0xa8] sm:$0xff] }
  0xdf   : > { %v889_v57 = vsel %vm507_vm11, %v2782_v29, %v2787_v30  ;;  %1122 = vmatpush.msra.mxu2 %v1098_v55  ;;  %1199 = vmatpush.msra.mxu3 %v1099_v62  ;;  %v1084_v62 = vld [vmem:[%s3956_s6 + $0x30] sm:$0xff] }
  0xe0   : > { %v823_v1 = vmul.f32 0.01, %v782_v63  ;;  %v3076_v8 = vsel %vm650_vm10, %v2800_v34, %v889_v57 }
  0xe1   : > { %1123 = vmatpush.msra.mxu2 %v1096_v56  ;;  %1200 = vmatpush.msra.mxu3 %v1097_v52  ;;  %v1083_v56 = vld [vmem:[%s3956_s6 + $0x28] sm:$0xff] }
  0xe2   : > { %v843_v10 = vmax.f32 %v782_v63, %v823_v1 }
  0xe3   : > { %1201 = vmatpush.msra.mxu3 %v1095_v15  ;;  %v1079_v15 = vld [vmem:[%s3956_s6 + $0x8] sm:$0xff] }
  0xe4   : > { %v3088_v16 = vpop.permute.xlu1 %484 }
  0xe5   : > { %vm509_vm12 = vcmp.eq.s32.totalorder %v3088_v16, 1  ;;  %v3095_v22 = vpop.permute.xlu0 %624  ;;  %v784_v24 = vpop.f32.mrf.mxu0 }
  0xe6   : > { %v891_v31 = vsel %vm509_vm12, %v2782_v29, %v2787_v30  ;;  %vm651_vm14 = vcmp.eq.s32.totalorder %v3095_v22, 1  ;;  %v785_v58 = vadd.f32 %v784_v24, %v666_v23  ;;  %959 = vmatmul.f32.gmra.mxu1 %v843_v10  ;;  %v1094_v10 = vld [vmem:[%s3956_s6 + $0x80] sm:$0xff]  ;;  %v1092_v23 = vld [vmem:[%s3956_s6 + $0x70] sm:$0xff]  ;;  %v526_v24 = vsel %vm504_vm5, %v2818_v2, %v2823_v42 }
  0xe7   : > { %v3115_v28 = vsel %vm651_vm14, %v2800_v34, %v890_v19  ;;  %v3120_v32 = vsel %vm652_vm13, %v2800_v34, %v891_v31  ;;  %1124 = vmatpush.msra.mxu2 %v1094_v10  ;;  %v1078_v10 = vld [vmem:[%s3956_s6] sm:$0xff]  ;;  %v531_v59 = vsel %vm509_vm12, %v2818_v2, %v2823_v42 }
  0xe8   : > { %v824_v40 = vmul.f32 0.01, %v785_v58  ;;  %v673_v12 = vsel %vm652_vm13, %v2830_v44, %v531_v59 }
  0xe9   : > { %1125 = vmatpush.msra.mxu2 %v1092_v23  ;;  %v528_v23 = vsel %vm506_vm7, %v2818_v2, %v2823_v42 }
  0xea   : > { %v844_v51 = vmax.f32 %v785_v58, %v824_v40  ;;  %v1093_v58 = vld [vmem:[%s3956_s6 + $0x78] sm:$0xff]  ;;  %v668_v40 = vsel %vm647_vm4, %v2830_v44, %v526_v24 }
  0xeb   : > { %1202 = vmatpush.msra.mxu3 %v1093_v58  ;;  %1126 = vmatpush.msra.mxu2 %v1090_v26 }
  0xec   : > { %v3141_v61 = vpop.permute.xlu1 %630 }
  0xed   : > { %vm653_vm15 = vcmp.eq.s32.totalorder %v3141_v61, 1  ;;  %v3147_v63 = vpop.permute.xlu0 %487  ;;  %v787_v57 = vpop.f32.mrf.mxu0  ;;  %1203 = vmatpush.msra.mxu3 %v1091_v6  ;;  %1127 = vmatpush.msra.mxu2 %v1088_v46 }
  0xee   : > { %vm510_vm1 = vcmp.eq.s32.totalorder %v3147_v63, 1  ;;  %v788_v1 = vadd.f32 %v787_v57, %v667_v4  ;;  %962 = vmatmul.f32.gmra.mxu1 %v844_v51  ;;  %v1087_v51 = vld [vmem:[%s3956_s6 + $0x48] sm:$0xff]  ;;  %v527_v4 = vsel %vm505_vm6, %v2818_v2, %v2823_v42 }
  0xef   : > { %v892_v43 = vsel %vm510_vm1, %v2782_v29, %v2787_v30  ;;  %v1086_v30 = vld [vmem:[%s3956_s6 + $0x40] sm:$0xff]  ;;  %1204 = vmatpush.msra.mxu3 %v1089_v20  ;;  %v669_v57 = vsel %vm648_vm9, %v2830_v44, %v527_v4  ;;  %v530_v20 = vsel %vm508_vm0, %v2818_v2, %v2823_v42  ;;  %v532_v16 = vsel %vm510_vm1, %v2818_v2, %v2823_v42 }
  0xf0   : > { %v825_v9 = vmul.f32 0.01, %v788_v1  ;;  %v3174_v19 = vsel %vm653_vm15, %v2800_v34, %v892_v43  ;;  %1128 = vmatpush.msra.mxu2 %v1086_v30  ;;  %v1082_v43 = vld [vmem:[%s3956_s6 + $0x20] sm:$0xff]  ;;  %v672_v60 = vsel %vm651_vm14, %v2830_v44, %v530_v20  ;;  %v674_v11 = vsel %vm653_vm15, %v2830_v44, %v532_v16 }
  0xf1   : > { %1205 = vmatpush.msra.mxu3 %v1087_v51 }
  0xf2   : > { %v845_v31 = vmax.f32 %v788_v1, %v825_v9  ;;  %1129 = vmatpush.msra.mxu2 %v1084_v62 }
  0xf4   : > { %1130 = vmatpush.msra.mxu2 %v1082_v43 }
  0xf5   : > { %v3193_v21 = vpop.permute.xlu0 %633  ;;  %v790_v41 = vpop.f32.mrf.mxu0 }
  0xf6   : > { %vm654_vm3 = vcmp.eq.s32.totalorder %v3193_v21, 1  ;;  %v791_v45 = vadd.f32 %v790_v41, %v668_v40  ;;  %965 = vmatmul.f32.gmra.mxu1 %v845_v31  ;;  %1131 = vmatpush.msra.mxu2 %v1080_v3  ;;  %v670_v31 = vsel %vm649_vm8, %v2830_v44, %v528_v23  ;;  %v529_v40 = vsel %vm507_vm11, %v2818_v2, %v2823_v42 }
  0xf7   : > { %v3212_v50 = vsel %vm654_vm3, %v2800_v34, %v893_v37  ;;  %v1085_v34 = vld [vmem:[%s3956_s6 + $0x38] sm:$0xff]  ;;  %v671_v35 = vsel %vm650_vm10, %v2830_v44, %v529_v40 }
  0xf8   : > { %v826_v29 = vmul.f32 0.01, %v791_v45  ;;  %1206 = vmatpush.msra.mxu3 %v1085_v34  ;;  %1132 = vmatpush.msra.mxu2 %v1078_v10 }
  0xfa   : > { %v846_v55 = vmax.f32 %v791_v45, %v826_v29  ;;  %1207 = vmatpush.msra.mxu3 %v1083_v56 }
  0xfc   : > { %1208 = vmatpush.msra.mxu3 %v1081_v39 }
  0xfd   : > { %v793_v1 = vpop.f32.mrf.mxu0 }
  0xfe   : > { %v794_v52 = vadd.f32 %v793_v1, %v669_v57  ;;  %968 = vmatmul.f32.gmra.mxu1 %v846_v55  ;;  %1209 = vmatpush.msra.mxu3 %v1079_v15 }
 0x100   : > { %v827_v9 = vmul.f32 0.01, %v794_v52 }
 0x102   : > { %v847_v24 = vmax.f32 %v794_v52, %v827_v9 }
 0x105   : > { %v796_v58 = vpop.f32.mrf.mxu0 }
 0x106   : > { %v797_v26 = vadd.f32 %v796_v58, %v670_v31  ;;  %971 = vmatmul.f32.gmra.mxu1 %v847_v24  ;;  %v533_v24 = vsel %vm511_vm2, %v2818_v2, %v2823_v42 }
 0x107   : > { %v675_v61 = vsel %vm654_vm3, %v2830_v44, %v533_v24 }
 0x108   : > { %v828_v6 = vmul.f32 0.01, %v797_v26 }
 0x10a   : > { %v848_v41 = vmax.f32 %v797_v26, %v828_v6 }
 0x10d   : > { %v799_v37 = vpop.f32.mrf.mxu0 }
 0x10e   : > { %v800_v45 = vadd.f32 %v799_v37, %v671_v35  ;;  %974 = vmatmul.f32.gmra.mxu1 %v848_v41 }
 0x110   : > { %v829_v46 = vmul.f32 0.01, %v800_v45 }
 0x112   : > { %v849_v25 = vmax.f32 %v800_v45, %v829_v46 }
 0x115   : > { %v802_v29 = vpop.f32.mrf.mxu0 }
 0x116   : > { %v803_v30 = vadd.f32 %v802_v29, %v672_v60  ;;  %977 = vmatmul.f32.gmra.mxu1 %v849_v25 }
 0x118   : > { %v830_v51 = vmul.f32 0.01, %v803_v30 }
 0x11a   : > { %v850_v55 = vmax.f32 %v803_v30, %v830_v51 }
 0x11b   : > { %v933_v62 = vpop.f32.mrf.mxu1 }
 0x11c   : > { %v934_v34 = vadd.f32 %v933_v62, %v2842_v53 }
 0x11d   : > { %v805_v4 = vpop.f32.mrf.mxu0 }
 0x11e   : > { %v993_v22 = vmul.f32 0.01, %v934_v34  ;;  %v806_v57 = vadd.f32 %v805_v4, %v673_v12  ;;  %980 = vmatmul.f32.gmra.mxu1 %v850_v55 }
 0x120   : > { %v831_v1 = vmul.f32 0.01, %v806_v57  ;;  %v1013_v43 = vmax.f32 %v934_v34, %v993_v22 }
 0x122   : > { %1133 = vmatmul.f32.vlgmr.msra.gmra.mxu2 %v1013_v43  ;;  %1210 = vmatmul.f32.vlgmr.msra.gmra.mxu3 %v1013_v43  ;;  %v851_v56 = vmax.f32 %v806_v57, %v831_v1 }
 0x123   : > { %v936_v52 = vpop.f32.mrf.mxu1 }
 0x124   : > { %v937_v53 = vadd.f32 %v936_v52, %v2846_v54 }
 0x125   : > { %v808_v3 = vpop.f32.mrf.mxu0 }
 0x126   : > { %v994_v39 = vmul.f32 0.01, %v937_v53  ;;  %v809_v9 = vadd.f32 %v808_v3, %v674_v11  ;;  %983 = vmatmul.f32.gmra.mxu1 %v851_v56 }
 0x128   : > { %v832_v10 = vmul.f32 0.01, %v809_v9  ;;  %v1014_v15 = vmax.f32 %v937_v53, %v994_v39 }
 0x12a   : > { %1136 = vmatmul.f32.gmra.mxu2 %v1014_v15  ;;  %1213 = vmatmul.f32.gmra.mxu3 %v1014_v15  ;;  %v852_v63 = vmax.f32 %v809_v9, %v832_v10 }
 0x12b   : > { %v939_v23 = vpop.f32.mrf.mxu1 }
 0x12c   : > { %v940_v54 = vadd.f32 %v939_v23, %v2807_v36 }
 0x12d   : > { %v811_v31 = vpop.f32.mrf.mxu0 }
 0x12e   : > { %v995_v58 = vmul.f32 0.01, %v940_v54  ;;  %v812_v26 = vadd.f32 %v811_v31, %v675_v61  ;;  %986 = vmatmul.f32.gmra.mxu1 %v852_v63 }
 0x130   : > { %v833_v6 = vmul.f32 0.01, %v812_v26  ;;  %v1015_v40 = vmax.f32 %v940_v54, %v995_v58 }
 0x132   : > { %1139 = vmatmul.f32.gmra.mxu2 %v1015_v40  ;;  %1216 = vmatmul.f32.gmra.mxu3 %v1015_v40  ;;  %v853_v41 = vmax.f32 %v812_v26, %v833_v6  ;;  %v1111_v6 = vld [vmem:[%s3957_s7] sm:$0x3] }
 0x133   : > { %v942_v35 = vpop.f32.mrf.mxu1  ;;  %v3313_v40 = vperm.slane %v1111_v6, 0 }
 0x134   : > { %v943_v37 = vadd.f32 %v942_v35, %v2863_v5 }
 0x136   : > { %v996_v7 = vmul.f32 0.01, %v943_v37  ;;  %989 = vmatmul.f32.gmra.mxu1 %v853_v41  ;;  %v3315_v41 = vperm.slane %v1111_v6, 1 }
 0x138   : > { %v1016_v2 = vmax.f32 %v943_v37, %v996_v7 }
 0x13a   : > { %1142 = vmatmul.f32.gmra.mxu2 %v1016_v2  ;;  %1219 = vmatmul.f32.gmra.mxu3 %v1016_v2 }
 0x13b   : > { %v945_v36 = vpop.f32.mrf.mxu1 }
 0x13c   : > { %v946_v42 = vadd.f32 %v945_v36, %v2892_v18 }
 0x13e   : > { %v997_v44 = vmul.f32 0.01, %v946_v42 }
 0x140   : > { %v1017_v21 = vmax.f32 %v946_v42, %v997_v44 }
 0x142   : > { %1145 = vmatmul.f32.gmra.mxu2 %v1017_v21  ;;  %1222 = vmatmul.f32.gmra.mxu3 %v1017_v21 }
 0x143   : > { %v948_v45 = vpop.f32.mrf.mxu1 }
 0x144   : > { %v949_v46 = vadd.f32 %v948_v45, %v2887_v17 }
 0x146   : > { %v998_v25 = vmul.f32 0.01, %v949_v46 }
 0x148   : > { %v1018_v20 = vmax.f32 %v949_v46, %v998_v25 }
 0x14a   : > { %1148 = vmatmul.f32.gmra.mxu2 %v1018_v20  ;;  %1225 = vmatmul.f32.gmra.mxu3 %v1018_v20 }
 0x14b   : > { %v951_v5 = vpop.f32.mrf.mxu1 }
 0x14c   : > { %v952_v60 = vadd.f32 %v951_v5, %v2908_v33 }
 0x14e   : > { %v999_v29 = vmul.f32 0.01, %v952_v60 }
 0x150   : > { %v1019_v30 = vmax.f32 %v952_v60, %v999_v29 }
 0x152   : > { %1151 = vmatmul.f32.gmra.mxu2 %v1019_v30  ;;  %1228 = vmatmul.f32.gmra.mxu3 %v1019_v30 }
 0x153   : > { %v954_v51 = vpop.f32.mrf.mxu1 }
 0x154   : > { %v955_v18 = vadd.f32 %v954_v51, %v2936_v49 }
 0x156   : > { %v1000_v59 = vmul.f32 0.01, %v955_v18 }
 0x158   : > { %v1020_v55 = vmax.f32 %v955_v18, %v1000_v59 }
 0x15a   : > { %1154 = vmatmul.f32.gmra.mxu2 %v1020_v55  ;;  %1231 = vmatmul.f32.gmra.mxu3 %v1020_v55 }
 0x15b   : > { %v957_v62 = vpop.f32.mrf.mxu1 }
 0x15c   : > { %v958_v17 = vadd.f32 %v957_v62, %v2932_v48 }
 0x15e   : > { %v1001_v34 = vmul.f32 0.01, %v958_v17 }
 0x160   : > { %v1021_v12 = vmax.f32 %v958_v17, %v1001_v34 }
 0x162   : > { %1157 = vmatmul.f32.gmra.mxu2 %v1021_v12  ;;  %1234 = vmatmul.f32.gmra.mxu3 %v1021_v12 }
 0x163   : > { %v960_v4 = vpop.f32.mrf.mxu1 }
 0x164   : > { %v961_v33 = vadd.f32 %v960_v4, %v2955_v0 }
 0x166   : > { %v1002_v22 = vmul.f32 0.01, %v961_v33 }
 0x168   : > { %v1022_v57 = vmax.f32 %v961_v33, %v1002_v22 }
 0x16a   : > { %1160 = vmatmul.f32.gmra.mxu2 %v1022_v57  ;;  %1237 = vmatmul.f32.gmra.mxu3 %v1022_v57 }
 0x16b   : > { %v963_v1 = vpop.f32.mrf.mxu1 }
 0x16c   : > { %v964_v49 = vadd.f32 %v963_v1, %v2988_v14 }
 0x16e   : > { %v1003_v43 = vmul.f32 0.01, %v964_v49 }
 0x170   : > { %v1023_v16 = vmax.f32 %v964_v49, %v1003_v43 }
 0x172   : > { %1163 = vmatmul.f32.gmra.mxu2 %v1023_v16  ;;  %1240 = vmatmul.f32.gmra.mxu3 %v1023_v16 }
 0x173   : > { %v966_v56 = vpop.f32.mrf.mxu1 }
 0x174   : > { %v967_v48 = vadd.f32 %v966_v56, %v2983_v13 }
 0x176   : > { %v1004_v52 = vmul.f32 0.01, %v967_v48 }
 0x178   : > { %v1024_v53 = vmax.f32 %v967_v48, %v1004_v52 }
 0x17a   : > { %1166 = vmatmul.f32.gmra.mxu2 %v1024_v53  ;;  %1243 = vmatmul.f32.gmra.mxu3 %v1024_v53 }
 0x17b   : > { %v969_v11 = vpop.f32.mrf.mxu1 }
 0x17c   : > { %v970_v0 = vadd.f32 %v969_v11, %v3011_v27 }
 0x17e   : > { %v1005_v3 = vmul.f32 0.01, %v970_v0 }
 0x180   : > { %v1025_v39 = vmax.f32 %v970_v0, %v1005_v3 }
 0x182   : > { %1169 = vmatmul.f32.gmra.mxu2 %v1025_v39  ;;  %1246 = vmatmul.f32.gmra.mxu3 %v1025_v39 }
 0x183   : > { %v972_v9 = vpop.f32.mrf.mxu1 }
 0x184   : > { %v973_v14 = vadd.f32 %v972_v9, %v3044_v47 }
 0x186   : > { %v1006_v10 = vmul.f32 0.01, %v973_v14 }
 0x188   : > { %v1026_v15 = vmax.f32 %v973_v14, %v1006_v10 }
 0x18a   : > { %1172 = vmatmul.f32.gmra.mxu2 %v1026_v15  ;;  %1249 = vmatmul.f32.gmra.mxu3 %v1026_v15 }
 0x18b   : > { %v975_v63 = vpop.f32.mrf.mxu1 }
 0x18c   : > { %v976_v13 = vadd.f32 %v975_v63, %v3039_v38 }
 0x18e   : > { %v1007_v23 = vmul.f32 0.01, %v976_v13 }
 0x190   : > { %v1027_v24 = vmax.f32 %v976_v13, %v1007_v23 }
 0x192   : > { %1175 = vmatmul.f32.gmra.mxu2 %v1027_v24  ;;  %1252 = vmatmul.f32.gmra.mxu3 %v1027_v24 }
 0x193   : > { %v978_v54 = vpop.f32.mrf.mxu1 }
 0x194   : > { %v979_v27 = vadd.f32 %v978_v54, %v3076_v8 }
 0x196   : > { %v1008_v61 = vmul.f32 0.01, %v979_v27 }
 0x198   : > { %v1028_v31 = vmax.f32 %v979_v27, %v1008_v61 }
 0x19a   : > { %1178 = vmatmul.f32.gmra.mxu2 %v1028_v31  ;;  %1255 = vmatmul.f32.gmra.mxu3 %v1028_v31 }
 0x19b   : > { %v981_v58 = vpop.f32.mrf.mxu1 }
 0x19c   : > { %v982_v47 = vadd.f32 %v981_v58, %v3115_v28 }
 0x19e   : > { %v1009_v26 = vmul.f32 0.01, %v982_v47 }
 0x1a0   : > { %v1029_v38 = vmax.f32 %v982_v47, %v1009_v26 }
 0x1a2   : > { %1181 = vmatmul.f32.gmra.mxu2 %v1029_v38  ;;  %1258 = vmatmul.f32.gmra.mxu3 %v1029_v38 }
 0x1a3   : > { %v984_v8 = vpop.f32.mrf.mxu1 }
 0x1a4   : > { %v985_v35 = vadd.f32 %v984_v8, %v3120_v32 }
 0x1a5   : > { %v1134_v37 = vpop.f32.mrf.mxu2  ;;  %v1211_v7 = vpop.f32.mrf.mxu3 }
 0x1a6   : > { %v1010_v2 = vmul.f32 0.01, %v985_v35  ;;  %v1135_v28 = vadd.f32 %v1134_v37, %v3313_v40  ;;  %v1212_v36 = vadd.f32 %v1211_v7, %v3315_v41 }
 0x1a8   : > { %v1271_v42 = vsub.f32 0.0, %v1135_v28  ;;  %v1272_v44 = vsub.f32 0.0, %v1212_v36  ;;  %v1030_v21 = vmax.f32 %v985_v35, %v1010_v2 }
 0x1aa   : > { %v1311_v45 = vmul.f32 1.442695, %v1271_v42  ;;  %v1313_v46 = vmul.f32 1.442695, %v1272_v44  ;;  %1184 = vmatmul.f32.gmra.mxu2 %v1030_v21  ;;  %1261 = vmatmul.f32.gmra.mxu3 %v1030_v21 }
 0x1ab   : > { %v987_v25 = vpop.f32.mrf.mxu1 }
 0x1ac   : > { %2280 = vpow2.f32 %v1311_v45  ;;  %v988_v20 = vadd.f32 %v987_v25, %v3174_v19 }
 0x1ad   : > { %2282 = vpow2.f32 %v1313_v46  ;;  %v1137_v32 = vpop.f32.mrf.mxu2  ;;  %v1214_v5 = vpop.f32.mrf.mxu3 }
 0x1ae   : > { %v1011_v60 = vmul.f32 0.01, %v988_v20  ;;  %v1138_v29 = vadd.f32 %v1137_v32, %v3313_v40  ;;  %v1215_v30 = vadd.f32 %v1214_v5, %v3315_v41 }
 0x1b0   : > { %v1273_v51 = vsub.f32 0.0, %v1138_v29  ;;  %v1274_v18 = vsub.f32 0.0, %v1215_v30  ;;  %v1031_v59 = vmax.f32 %v988_v20, %v1011_v60 }
 0x1b2   : > { %v2281_v55 = vpop.eup %2280  ;;  %v1315_v62 = vmul.f32 1.442695, %v1273_v51  ;;  %1187 = vmatmul.f32.gmra.mxu2 %v1031_v59  ;;  %1264 = vmatmul.f32.gmra.mxu3 %v1031_v59  ;;  %v1317_v12 = vmul.f32 1.442695, %v1274_v18 }
 0x1b3   : > { %v2283_v17 = vpop.eup %2282  ;;  %v1391_v34 = vadd.f32 1.0, %v2281_v55  ;;  %v990_v4 = vpop.f32.mrf.mxu1 }
 0x1b4   : > { %v1392_v19 = vadd.f32 1.0, %v2283_v17  ;;  %2284 = vpow2.f32 %v1315_v62  ;;  %v991_v33 = vadd.f32 %v990_v4, %v3212_v50 }
 0x1b5   : > { %2286 = vrcp.f32 %v1391_v34  ;;  %v1140_v22 = vpop.f32.mrf.mxu2  ;;  %v1217_v57 = vpop.f32.mrf.mxu3  ;;  %v1440_v3 = vand.u32 2147483647, %v1391_v34  ;;  %v1442_v14 = vand.u32 2147483648, %v1391_v34  ;;  %vm1436_vm4 = vweird.f32 %v1391_v34 }
 0x1b6   : > { %2288 = vrcp.f32 %v1392_v19  ;;  %v1012_v1 = vmul.f32 0.01, %v991_v33  ;;  %v1141_v49 = vadd.f32 %v1140_v22, %v3313_v40  ;;  %v1218_v43 = vadd.f32 %v1217_v57, %v3315_v41 }
 0x1b7   : > { %2290 = vpow2.f32 %v1317_v12  ;;  %v1455_v15 = vand.u32 2147483647, %v1392_v19  ;;  %v1457_v24 = vand.u32 2147483648, %v1392_v19  ;;  %vm3339_vm6 = vcmp.eq.f32.partialorder %v1440_v3, 8.507059e+37 }
 0x1b8   : > { %v1032_v16 = vmax.f32 %v991_v33, %v1012_v1  ;;  %v1275_v48 = vsub.f32 0.0, %v1141_v49  ;;  %v1276_v52 = vsub.f32 0.0, %v1218_v43  ;;  %vm1451_vm7 = vweird.f32 %v1392_v19 }
 0x1b9   : > { %v1443_v7 = vor.u32 1.1754944e-38, %v1442_v14  ;;  %vm3343_vm10 = vcmp.eq.f32.partialorder %v1455_v15, 8.507059e+37  ;;  %v1458_v36 = vor.u32 1.1754944e-38, %v1457_v24 }
 0x1ba   : > { %v2285_v56 = vpop.eup %2284  ;;  %1190 = vmatmul.f32.gmra.mxu2 %v1032_v16  ;;  %1267 = vmatmul.f32.gmra.mxu3 %v1032_v16  ;;  %v1319_v39 = vmul.f32 1.442695, %v1275_v48  ;;  %v1321_v27 = vmul.f32 1.442695, %v1276_v52 }
 0x1bb   : > { %v2287_v53 = vpop.eup %2286  ;;  %v3326_v11 = vadd.f32 1.0, %v2285_v56 }
 0x1bc   : > { %v2289_v50 = vpop.eup %2288  ;;  %v1432_v0 = vmul.f32 %v2287_v53, %v1391_v34  ;;  %vm1437_vm5 = vweird.f32 %v2287_v53 }
 0x1bd   : > { %v2291_v9 = vpop.eup %2290  ;;  %v1447_v10 = vmul.f32 %v2289_v50, %v1392_v19  ;;  %2292 = vrcp.f32 %v3326_v11  ;;  %v1143_v63 = vpop.f32.mrf.mxu2  ;;  %vm1452_vm8 = vweird.f32 %v2289_v50  ;;  %vm1438_vm9 = vmor %vm1436_vm4, %vm1437_vm5  ;;  %v1470_v21 = vand.u32 2147483647, %v3326_v11 }
 0x1be   : > { %v1220_v13 = vpop.f32.mrf.mxu3  ;;  %v1433_v23 = vsub.f32 1.0, %v1432_v0  ;;  %v3330_v54 = vadd.f32 1.0, %v2291_v9  ;;  %2294 = vpow2.f32 %v1319_v39  ;;  %v1144_v31 = vadd.f32 %v1143_v63, %v3313_v40  ;;  %vm1453_vm11 = vmor %vm1451_vm7, %vm1452_vm8 }
 0x1bf   : > { %v1448_v61 = vsub.f32 1.0, %v1447_v10  ;;  %v1221_v58 = vadd.f32 %v1220_v13, %v3315_v41  ;;  %v1472_v32 = vand.u32 2147483648, %v3326_v11  ;;  %vm1466_vm12 = vweird.f32 %v3326_v11 }
 0x1c0   : > { %v1434_v47 = vmul.f32 %v2287_v53, %v1433_v23  ;;  %2296 = vrcp.f32 %v3330_v54  ;;  %v1277_v8 = vsub.f32 0.0, %v1144_v31  ;;  %v1485_v62 = vand.u32 2147483647, %v3330_v54 }
 0x1c1   : > { %v1449_v6 = vmul.f32 %v2289_v50, %v1448_v61  ;;  %2298 = vpow2.f32 %v1321_v27  ;;  %v1278_v35 = vsub.f32 0.0, %v1221_v58  ;;  %v1487_v4 = vand.u32 2147483648, %v3330_v54 }
 0x1c2   : > { %v1435_v38 = vadd.f32 %v2287_v53, %v1434_v47  ;;  %v1323_v45 = vmul.f32 1.442695, %v1277_v8  ;;  %vm1471_vm13 = vcmp.eq.f32.partialorder %v1470_v21, 8.507059e+37  ;;  %v1473_v1 = vor.u32 1.1754944e-38, %v1472_v32 }
 0x1c3   : > { %v2293_v37 = vpop.eup %2292  ;;  %v1450_v2 = vadd.f32 %v2289_v50, %v1449_v6  ;;  %v1325_v5 = vmul.f32 1.442695, %v1278_v35  ;;  %vm1481_vm14 = vweird.f32 %v3330_v54  ;;  %vm3372_vm2 = vcmp.eq.f32.partialorder %v1485_v62, 8.507059e+37 }
 0x1c4   : > { %v1439_v42 = vsel %vm1438_vm9, %v2287_v53, %v1435_v38  ;;  %v1462_v44 = vmul.f32 %v2293_v37, %v3326_v11  ;;  %v2295_v46 = vpop.eup %2294  ;;  %2300 = vpow2.f32 %v1323_v45  ;;  %vm1467_vm0 = vweird.f32 %v2293_v37 }
 0x1c5   : > { %v1444_v25 = vsel %vm3339_vm6, %v1443_v7, %v1439_v42  ;;  %v1454_v20 = vsel %vm1453_vm11, %v2289_v50, %v1450_v2  ;;  %v1146_v60 = vpop.f32.mrf.mxu2  ;;  %v3358_v59 = vadd.f32 1.0, %v2295_v46  ;;  %2302 = vpow2.f32 %v1325_v5  ;;  %vm1468_vm15 = vmor %vm1466_vm12, %vm1467_vm0 }
 0x1c6   : > { %v1223_v29 = vpop.f32.mrf.mxu3  ;;  %v2297_v30 = vpop.eup %2296  ;;  %2031 = vst [vmem:[%s3353_s12] sm:$0xff] %v1444_v25  ;;  %v1459_v51 = vsel %vm3343_vm10, %v1458_v36, %v1454_v20  ;;  %v1463_v18 = vsub.f32 1.0, %v1462_v44  ;;  %v1147_v17 = vadd.f32 %v1146_v60, %v3313_v40  ;;  %v1488_v52 = vor.u32 1.1754944e-38, %v1487_v4 }
 0x1c7   : > { %2032 = vst [vmem:[%s3353_s12 + $0x8] sm:$0xff] %v1459_v51  ;;  %v1477_v55 = vmul.f32 %v2297_v30, %v3330_v54  ;;  %v2299_v34 = vpop.eup %2298  ;;  %2304 = vrcp.f32 %v3358_v59  ;;  %vm1482_vm1 = vweird.f32 %v2297_v30  ;;  %v1224_v43 = vadd.f32 %v1223_v29, %v3315_v41 }
 0x1c8   : > { %v1464_v12 = vmul.f32 %v2293_v37, %v1463_v18  ;;  %v3367_v33 = vadd.f32 1.0, %v2299_v34  ;;  %v1279_v22 = vsub.f32 0.0, %v1147_v17  ;;  %v1500_v3 = vand.u32 2147483647, %v3358_v59  ;;  %vm1483_vm3 = vmor %vm1481_vm14, %vm1482_vm1 }
 0x1c9   : > { %v1478_v19 = vsub.f32 1.0, %v1477_v55  ;;  %v1502_v15 = vand.u32 2147483648, %v3358_v59  ;;  %v1280_v27 = vsub.f32 0.0, %v1224_v43  ;;  %vm1496_vm4 = vweird.f32 %v3358_v59 }
 0x1ca   : > { %v1465_v57 = vadd.f32 %v2293_v37, %v1464_v12  ;;  %2306 = vrcp.f32 %v3367_v33  ;;  %v2301_v16 = vpop.eup %2300  ;;  %v1327_v53 = vmul.f32 1.442695, %v1279_v22  ;;  %v1515_v63 = vand.u32 2147483647, %v3367_v33 }
 0x1cb   : > { %v1479_v49 = vmul.f32 %v2297_v30, %v1478_v19  ;;  %v2303_v11 = vpop.eup %2302  ;;  %v3377_v39 = vadd.f32 1.0, %v2301_v16  ;;  %v1517_v31 = vand.u32 2147483648, %v3367_v33  ;;  %vm3395_vm5 = vcmp.eq.f32.partialorder %v1500_v3, 8.507059e+37 }
 0x1cc   : > { %v1469_v56 = vsel %vm1468_vm15, %v2293_v37, %v1465_v57  ;;  %v3385_v13 = vadd.f32 1.0, %v2303_v11  ;;  %2308 = vpow2.f32 %v1327_v53  ;;  %v1503_v26 = vor.u32 1.1754944e-38, %v1502_v15 }
 0x1cd   : > { %v1474_v50 = vsel %vm1471_vm13, %v1473_v1, %v1469_v56  ;;  %v1480_v0 = vadd.f32 %v2297_v30, %v1479_v49  ;;  %v1149_v9 = vpop.f32.mrf.mxu2  ;;  %v2305_v10 = vpop.eup %2304  ;;  %2310 = vrcp.f32 %v3377_v39  ;;  %vm1511_vm6 = vweird.f32 %v3367_v33 }
 0x1ce   : > { %v1226_v14 = vpop.f32.mrf.mxu3  ;;  %2033 = vst [vmem:[%s3353_s12 + $0x10] sm:$0xff] %v1474_v50  ;;  %v1492_v24 = vmul.f32 %v2305_v10, %v3358_v59  ;;  %2312 = vrcp.f32 %v3385_v13  ;;  %vm1497_vm7 = vweird.f32 %v2305_v10  ;;  %vm3401_vm8 = vcmp.eq.f32.partialorder %v1515_v63, 8.507059e+37 }
 0x1cf   : > { %v1484_v23 = vsel %vm1483_vm3, %v2297_v30, %v1480_v0  ;;  %v1329_v35 = vmul.f32 1.442695, %v1280_v27  ;;  %v1518_v2 = vor.u32 1.1754944e-38, %v1517_v31  ;;  %vm1526_vm9 = vweird.f32 %v3377_v39  ;;  %vm1498_vm11 = vmor %vm1496_vm4, %vm1497_vm7 }
 0x1d0   : > { %v1489_v61 = vsel %vm3372_vm2, %v1488_v52, %v1484_v23  ;;  %v2307_v54 = vpop.eup %2306  ;;  %v1493_v58 = vsub.f32 1.0, %v1492_v24  ;;  %v1150_v28 = vadd.f32 %v1149_v9, %v3313_v40  ;;  %v1227_v32 = vadd.f32 %v1226_v14, %v3315_v41 }
 0x1d1   : > { %2034 = vst [vmem:[%s3353_s12 + $0x18] sm:$0xff] %v1489_v61  ;;  %v1507_v6 = vmul.f32 %v2307_v54, %v3367_v33  ;;  %vm1512_vm10 = vweird.f32 %v2307_v54  ;;  %2314 = vpow2.f32 %v1329_v35  ;;  %v1530_v29 = vand.u32 2147483647, %v3377_v39 }
 0x1d2   : > { %v1494_v38 = vmul.f32 %v2305_v10, %v1493_v58  ;;  %v2309_v37 = vpop.eup %2308  ;;  %v1281_v20 = vsub.f32 0.0, %v1150_v28  ;;  %v1532_v30 = vand.u32 2147483648, %v3377_v39  ;;  %vm1513_vm0 = vmor %vm1511_vm6, %vm1512_vm10  ;;  %v1545_v62 = vand.u32 2147483647, %v3385_v13 }
 0x1d3   : > { %v1508_v7 = vsub.f32 1.0, %v1507_v6  ;;  %v2311_v36 = vpop.eup %2310  ;;  %v3407_v44 = vadd.f32 1.0, %v2309_v37  ;;  %v1547_v17 = vand.u32 2147483648, %v3385_v13  ;;  %v1282_v22 = vsub.f32 0.0, %v1227_v32 }
 0x1d4   : > { %v1495_v42 = vadd.f32 %v2305_v10, %v1494_v38  ;;  %v1522_v25 = vmul.f32 %v2311_v36, %v3377_v39  ;;  %v2313_v5 = vpop.eup %2312  ;;  %vm1527_vm12 = vweird.f32 %v2311_v36  ;;  %v1331_v34 = vmul.f32 1.442695, %v1281_v20 }
 0x1d5   : > { %v1152_v21 = vpop.f32.mrf.mxu2  ;;  %v1509_v46 = vmul.f32 %v2307_v54, %v1508_v7  ;;  %2316 = vrcp.f32 %v3407_v44  ;;  %v1537_v55 = vmul.f32 %v2313_v5, %v3385_v13  ;;  %vm1542_vm13 = vweird.f32 %v2313_v5  ;;  %vm1528_vm14 = vmor %vm1526_vm9, %vm1527_vm12 }
 0x1d6   : > { %v1229_v45 = vpop.f32.mrf.mxu3  ;;  %v1499_v60 = vsel %vm1498_vm11, %v2305_v10, %v1495_v42  ;;  %v1523_v59 = vsub.f32 1.0, %v1522_v25  ;;  %2318 = vpow2.f32 %v1331_v34  ;;  %v1153_v49 = vadd.f32 %v1152_v21, %v3313_v40 }
 0x1d7   : > { %v1504_v51 = vsel %vm3395_vm5, %v1503_v26, %v1499_v60  ;;  %v1510_v18 = vadd.f32 %v2307_v54, %v1509_v46  ;;  %v1538_v19 = vsub.f32 1.0, %v1537_v55  ;;  %v2315_v57 = vpop.eup %2314  ;;  %v1333_v56 = vmul.f32 1.442695, %v1282_v22 }
 0x1d8   : > { %2035 = vst [vmem:[%s3353_s12 + $0x20] sm:$0xff] %v1504_v51  ;;  %v1524_v4 = vmul.f32 %v2311_v36, %v1523_v59  ;;  %v3430_v16 = vadd.f32 1.0, %v2315_v57  ;;  %v1533_v52 = vor.u32 1.1754944e-38, %v1532_v30  ;;  %vm1541_vm15 = vweird.f32 %v3385_v13 }
 0x1d9   : > { %v1514_v12 = vsel %vm1513_vm0, %v2307_v54, %v1510_v18  ;;  %v1539_v43 = vmul.f32 %v2313_v5, %v1538_v19  ;;  %v1283_v53 = vsub.f32 0.0, %v1153_v49  ;;  %v1230_v11 = vadd.f32 %v1229_v45, %v3315_v41  ;;  %vm1543_vm2 = vmor %vm1541_vm15, %vm1542_vm13 }
 0x1da   : > { %v1519_v1 = vsel %vm3401_vm8, %v1518_v2, %v1514_v12  ;;  %v1525_v33 = vadd.f32 %v2311_v36, %v1524_v4  ;;  %vm1531_vm1 = vcmp.eq.f32.partialorder %v1530_v29, 8.507059e+37  ;;  %vm1546_vm3 = vcmp.eq.f32.partialorder %v1545_v62, 8.507059e+37 }
 0x1db   : > { %2036 = vst [vmem:[%s3353_s12 + $0x28] sm:$0xff] %v1519_v1  ;;  %v2317_v48 = vpop.eup %2316  ;;  %v1540_v9 = vadd.f32 %v2313_v5, %v1539_v43  ;;  %v1548_v39 = vor.u32 1.1754944e-38, %v1547_v17  ;;  %2320 = vrcp.f32 %v3430_v16  ;;  %v1560_v13 = vand.u32 2147483647, %v3407_v44 }
 0x1dc   : > { %v1529_v3 = vsel %vm1528_vm14, %v2311_v36, %v1525_v33  ;;  %v1552_v14 = vmul.f32 %v2317_v48, %v3407_v44  ;;  %2322 = vpow2.f32 %v1333_v56  ;;  %v2319_v23 = vpop.eup %2318  ;;  %v1562_v27 = vand.u32 2147483648, %v3407_v44 }
 0x1dd   : > { %v1155_v50 = vpop.f32.mrf.mxu2  ;;  %v1534_v10 = vsel %vm1531_vm1, %v1533_v52, %v1529_v3  ;;  %v1544_v15 = vsel %vm1543_vm2, %v2313_v5, %v1540_v9  ;;  %v1335_v61 = vmul.f32 1.442695, %v1283_v53  ;;  %v1284_v31 = vsub.f32 0.0, %v1230_v11 }
 0x1de   : > { %v1232_v0 = vpop.f32.mrf.mxu3  ;;  %2037 = vst [vmem:[%s3353_s12 + $0x30] sm:$0xff] %v1534_v10  ;;  %v1553_v63 = vsub.f32 1.0, %v1552_v14  ;;  %v1549_v24 = vsel %vm1546_vm3, %v1548_v39, %v1544_v15  ;;  %vm1557_vm4 = vweird.f32 %v2317_v48  ;;  %v3444_v58 = vadd.f32 1.0, %v2319_v23 }
 0x1df   : > { %2038 = vst [vmem:[%s3353_s12 + $0x38] sm:$0xff] %v1549_v24  ;;  %v1156_v47 = vadd.f32 %v1155_v50, %v3313_v40  ;;  %vm1556_vm5 = vweird.f32 %v3407_v44  ;;  %2324 = vpow2.f32 %v1335_v61  ;;  %v1337_v26 = vmul.f32 1.442695, %v1284_v31 }
 0x1e0   : > { %v1554_v54 = vmul.f32 %v2317_v48, %v1553_v63  ;;  %v1233_v6 = vadd.f32 %v1232_v0, %v3315_v41  ;;  %v1575_v8 = vand.u32 2147483647, %v3430_v16  ;;  %v1577_v35 = vand.u32 2147483648, %v3430_v16  ;;  %vm1558_vm6 = vmor %vm1556_vm5, %vm1557_vm4 }
 0x1e1   : > { %2326 = vrcp.f32 %v3444_v58  ;;  %v2321_v37 = vpop.eup %2320  ;;  %v1563_v7 = vor.u32 1.1754944e-38, %v1562_v27  ;;  %v1285_v2 = vsub.f32 0.0, %v1156_v47  ;;  %vm1561_vm7 = vcmp.eq.f32.partialorder %v1560_v13, 8.507059e+37 }
 0x1e2   : > { %v1555_v38 = vadd.f32 %v2317_v48, %v1554_v54  ;;  %2328 = vpow2.f32 %v1337_v26  ;;  %v1286_v28 = vsub.f32 0.0, %v1233_v6  ;;  %v2323_v44 = vpop.eup %2322  ;;  %v1567_v45 = vmul.f32 %v2321_v37, %v3430_v16 }
 0x1e3   : > { %vm1571_vm8 = vweird.f32 %v3430_v16  ;;  %v3454_v25 = vadd.f32 1.0, %v2323_v44  ;;  %v1339_v20 = vmul.f32 1.442695, %v1285_v2  ;;  %vm3457_vm9 = vcmp.eq.f32.partialorder %v1575_v8, 8.507059e+37 }
 0x1e4   : > { %v1559_v21 = vsel %vm1558_vm6, %v2317_v48, %v1555_v38  ;;  %v1568_v32 = vsub.f32 1.0, %v1567_v45  ;;  %v1578_v60 = vor.u32 1.1754944e-38, %v1577_v35  ;;  %vm1572_vm10 = vweird.f32 %v2321_v37 }
 0x1e5   : > { %v1158_v36 = vpop.f32.mrf.mxu2  ;;  %v1564_v46 = vsel %vm1561_vm7, %v1563_v7, %v1559_v21  ;;  %v2325_v30 = vpop.eup %2324  ;;  %2330 = vrcp.f32 %v3454_v25  ;;  %v1341_v51 = vmul.f32 1.442695, %v1286_v28  ;;  %vm1586_vm11 = vweird.f32 %v3444_v58  ;;  %vm1573_vm0 = vmor %vm1571_vm8, %vm1572_vm10 }
 0x1e6   : > { %v1235_v42 = vpop.f32.mrf.mxu3  ;;  %2039 = vst [vmem:[%s3353_s12 + $0x40] sm:$0xff] %v1564_v46  ;;  %v1159_v29 = vadd.f32 %v1158_v36, %v3313_v40  ;;  %v1569_v55 = vmul.f32 %v2321_v37, %v1568_v32  ;;  %v3464_v62 = vadd.f32 1.0, %v2325_v30  ;;  %2332 = vpow2.f32 %v1339_v20 }
 0x1e7   : > { %v1236_v18 = vadd.f32 %v1235_v42, %v3315_v41  ;;  %v2327_v59 = vpop.eup %2326  ;;  %v1590_v4 = vand.u32 2147483647, %v3444_v58  ;;  %v1592_v19 = vand.u32 2147483648, %v3444_v58  ;;  %v1605_v57 = vand.u32 2147483647, %v3454_v25 }
 0x1e8   : > { %v1287_v17 = vsub.f32 0.0, %v1159_v29  ;;  %v2329_v34 = vpop.eup %2328  ;;  %v1582_v12 = vmul.f32 %v2327_v59, %v3444_v58  ;;  %v1570_v22 = vadd.f32 %v2321_v37, %v1569_v55  ;;  %v1607_v1 = vand.u32 2147483648, %v3454_v25 }
 0x1e9   : > { %2334 = vrcp.f32 %v3464_v62  ;;  %vm1587_vm12 = vweird.f32 %v2327_v59  ;;  %v3476_v33 = vadd.f32 1.0, %v2329_v34  ;;  %v1620_v52 = vand.u32 2147483647, %v3464_v62 }
 0x1ea   : > { %v1583_v49 = vsub.f32 1.0, %v1582_v12  ;;  %2336 = vpow2.f32 %v1341_v51  ;;  %v1574_v48 = vsel %vm1573_vm0, %v2321_v37, %v1570_v22  ;;  %v1343_v53 = vmul.f32 1.442695, %v1287_v17  ;;  %vm1588_vm1 = vmor %vm1586_vm11, %vm1587_vm12 }
 0x1eb   : > { %v1288_v11 = vsub.f32 0.0, %v1236_v18  ;;  %v2331_v50 = vpop.eup %2330  ;;  %v1579_v0 = vsel %vm3457_vm9, %v1578_v60, %v1574_v48  ;;  %v1622_v3 = vand.u32 2147483648, %v3464_v62  ;;  %2338 = vrcp.f32 %v3476_v33 }
 0x1ec   : > { %v1584_v16 = vmul.f32 %v2327_v59, %v1583_v49  ;;  %v2333_v9 = vpop.eup %2332  ;;  %2040 = vst [vmem:[%s3353_s12 + $0x48] sm:$0xff] %v1579_v0  ;;  %vm3486_vm13 = vcmp.eq.f32.partialorder %v1590_v4, 8.507059e+37  ;;  %v1593_v10 = vor.u32 1.1754944e-38, %v1592_v19  ;;  %v1597_v39 = vmul.f32 %v2331_v50, %v3454_v25 }
 0x1ed   : > { %v1161_v43 = vpop.f32.mrf.mxu2  ;;  %vm1601_vm14 = vweird.f32 %v3454_v25  ;;  %vm3492_vm15 = vcmp.eq.f32.partialorder %v1605_v57, 8.507059e+37  ;;  %v3496_v13 = vadd.f32 1.0, %v2333_v9  ;;  %2340 = vpow2.f32 %v1343_v53 }
 0x1ee   : > { %v3478_v56 = vpop.f32.mrf.mxu3  ;;  %v1585_v15 = vadd.f32 %v2327_v59, %v1584_v16  ;;  %v1598_v24 = vsub.f32 1.0, %v1597_v39  ;;  %v1608_v27 = vor.u32 1.1754944e-38, %v1607_v1  ;;  %vm1616_vm2 = vweird.f32 %v3464_v62 }
 0x1ef   : > { %v2335_v23 = vpop.eup %2334  ;;  %v1345_v61 = vmul.f32 1.442695, %v1288_v11  ;;  %vm1602_vm3 = vweird.f32 %v2331_v50  ;;  %vm3503_vm4 = vcmp.eq.f32.partialorder %v1620_v52, 8.507059e+37  ;;  %v1623_v6 = vor.u32 1.1754944e-38, %v1622_v3 }
 0x1f0   : > { %v2337_v31 = vpop.eup %2336  ;;  %v1589_v54 = vsel %vm1588_vm1, %v2327_v59, %v1585_v15  ;;  %v1612_v47 = vmul.f32 %v2335_v23, %v3464_v62  ;;  %v1599_v38 = vmul.f32 %v2331_v50, %v1598_v24  ;;  %v1635_v8 = vand.u32 2147483647, %v3476_v33  ;;  %vm1603_vm6 = vmor %vm1601_vm14, %vm1602_vm3 }
 0x1f1   : > { %v1594_v58 = vsel %vm3486_vm13, %v1593_v10, %v1589_v54  ;;  %2342 = vrcp.f32 %v3496_v13  ;;  %v2339_v35 = vpop.eup %2338  ;;  %v1637_v7 = vand.u32 2147483648, %v3476_v33  ;;  %v3513_v2 = vadd.f32 1.0, %v2337_v31 }
 0x1f2   : > { %2041 = vst [vmem:[%s3353_s12 + $0x50] sm:$0xff] %v1594_v58  ;;  %v1613_v37 = vsub.f32 1.0, %v1612_v47  ;;  %v1162_v28 = vadd.f32 %v1161_v43, %v3313_v40  ;;  %v1600_v44 = vadd.f32 %v2331_v50, %v1599_v38  ;;  %vm1617_vm5 = vweird.f32 %v2335_v23 }
 0x1f3   : > { %v1627_v21 = vmul.f32 %v2339_v35, %v3476_v33  ;;  %2344 = vpow2.f32 %v1345_v61  ;;  %v2341_v45 = vpop.eup %2340  ;;  %v1650_v20 = vand.u32 2147483647, %v3496_v13  ;;  %v1652_v32 = vand.u32 2147483648, %v3496_v13  ;;  %vm1618_vm9 = vmor %vm1616_vm2, %vm1617_vm5 }
 0x1f4   : > { %v1614_v46 = vmul.f32 %v2335_v23, %v1613_v37  ;;  %2346 = vrcp.f32 %v3513_v2  ;;  %v1604_v5 = vsel %vm1603_vm6, %v2331_v50, %v1600_v44  ;;  %vm1631_vm7 = vweird.f32 %v3476_v33 }
 0x1f5   : > { %v3516_v36 = vpop.f32.mrf.mxu2  ;;  %v1628_v60 = vsub.f32 1.0, %v1627_v21  ;;  %vm3528_vm8 = vcmp.eq.f32.partialorder %v1635_v8, 8.507059e+37  ;;  %v1609_v30 = vsel %vm3492_vm15, %v1608_v27, %v1604_v5  ;;  %v1638_v51 = vor.u32 1.1754944e-38, %v1637_v7 }
 0x1f6   : > { %v3518_v42 = vpop.f32.mrf.mxu3  ;;  %v1615_v25 = vadd.f32 %v2335_v23, %v1614_v46  ;;  %v3534_v18 = vadd.f32 1.0, %v2341_v45  ;;  %2042 = vst [vmem:[%s3353_s12 + $0x58] sm:$0xff] %v1609_v30  ;;  %vm1632_vm10 = vweird.f32 %v2339_v35  ;;  %vm1646_vm11 = vweird.f32 %v3496_v13 }
 0x1f7   : > { %v2343_v59 = vpop.eup %2342  ;;  %v1629_v55 = vmul.f32 %v2339_v35, %v1628_v60  ;;  %v1289_v17 = vsub.f32 0.0, %v1162_v28  ;;  %vm3542_vm0 = vcmp.eq.f32.partialorder %v1650_v20, 8.507059e+37  ;;  %v1653_v19 = vor.u32 1.1754944e-38, %v1652_v32  ;;  %vm1633_vm12 = vmor %vm1631_vm7, %vm1632_vm10 }
 0x1f8   : > { %v1619_v34 = vsel %vm1618_vm9, %v2335_v23, %v1615_v25  ;;  %v1642_v12 = vmul.f32 %v2343_v59, %v3496_v13  ;;  %v1665_v22 = vand.u32 2147483647, %v3513_v2  ;;  %v1667_v49 = vand.u32 2147483648, %v3513_v2 }
 0x1f9   : > { %v2345_v57 = vpop.eup %2344  ;;  %v1624_v62 = vsel %vm3503_vm4, %v1623_v6, %v1619_v34  ;;  %v1630_v1 = vadd.f32 %v2339_v35, %v1629_v55  ;;  %2348 = vrcp.f32 %v3534_v18  ;;  %vm1661_vm13 = vweird.f32 %v3513_v2 }
 0x1fa   : > { %v2347_v43 = vpop.eup %2346  ;;  %2043 = vst [vmem:[%s3353_s12 + $0x60] sm:$0xff] %v1624_v62  ;;  %v1643_v48 = vsub.f32 1.0, %v1642_v12  ;;  %v3556_v52 = vadd.f32 1.0, %v2345_v57  ;;  %v1239_v53 = vadd.f32 %v3478_v56, %v3315_v41  ;;  %vm1647_vm14 = vweird.f32 %v2343_v59 }
 0x1fb   : > { %v1634_v0 = vsel %vm1633_vm12, %v2339_v35, %v1630_v1  ;;  %v1657_v16 = vmul.f32 %v2347_v43, %v3513_v2  ;;  %v1347_v3 = vmul.f32 1.442695, %v1289_v17  ;;  %v1680_v14 = vand.u32 2147483647, %v3534_v18  ;;  %vm1648_vm2 = vmor %vm1646_vm11, %vm1647_vm14 }
 0x1fc   : > { %v1639_v33 = vsel %vm3528_vm8, %v1638_v51, %v1634_v0  ;;  %v1644_v9 = vmul.f32 %v2343_v59, %v1643_v48  ;;  %v1682_v10 = vand.u32 2147483648, %v3534_v18  ;;  %vm3566_vm15 = vcmp.eq.f32.partialorder %v1665_v22, 8.507059e+37 }
 0x1fd   : > { %v1167_v11 = vpop.f32.mrf.mxu2  ;;  %2044 = vst [vmem:[%s3353_s12 + $0x68] sm:$0xff] %v1639_v33  ;;  %v1658_v39 = vsub.f32 1.0, %v1657_v16  ;;  %v1668_v56 = vor.u32 1.1754944e-38, %v1667_v49  ;;  %2350 = vrcp.f32 %v3556_v52  ;;  %vm1676_vm1 = vweird.f32 %v3534_v18 }
 0x1fe   : > { %v1244_v50 = vpop.f32.mrf.mxu3  ;;  %v1645_v63 = vadd.f32 %v2343_v59, %v1644_v9  ;;  %2352 = vpow2.f32 %v1347_v3  ;;  %v1290_v23 = vsub.f32 0.0, %v1239_v53  ;;  %vm1662_vm3 = vweird.f32 %v2347_v43 }
 0x1ff   : > { %v2349_v24 = vpop.eup %2348  ;;  %v1659_v27 = vmul.f32 %v2347_v43, %v1658_v39  ;;  %v1165_v61 = vadd.f32 %v3516_v36, %v3313_v40  ;;  %v1242_v31 = vadd.f32 %v3518_v42, %v3315_v41  ;;  %vm3580_vm4 = vcmp.eq.f32.partialorder %v1680_v14, 8.507059e+37  ;;  %vm1663_vm5 = vmor %vm1661_vm13, %vm1662_vm3 }
 0x200   : > { %v1649_v54 = vsel %vm1648_vm2, %v2343_v59, %v1645_v63  ;;  %v1672_v47 = vmul.f32 %v2349_v24, %v3534_v18  ;;  %v1683_v6 = vor.u32 1.1754944e-38, %v1682_v10  ;;  %v1349_v38 = vmul.f32 1.442695, %v1290_v23 }
 0x201   : > { %v1654_v13 = vsel %vm3542_vm0, %v1653_v19, %v1649_v54  ;;  %v1660_v58 = vadd.f32 %v2347_v43, %v1659_v27  ;;  %v1291_v8 = vsub.f32 0.0, %v1165_v61  ;;  %v1292_v37 = vsub.f32 0.0, %v1242_v31 }
 0x202   : > { %2045 = vst [vmem:[%s3353_s12 + $0x70] sm:$0xff] %v1654_v13  ;;  %v1673_v35 = vsub.f32 1.0, %v1672_v47  ;;  %v1168_v7 = vadd.f32 %v1167_v11, %v3313_v40  ;;  %v1245_v28 = vadd.f32 %v1244_v50, %v3315_v41  ;;  %2354 = vpow2.f32 %v1349_v38 }
 0x203   : > { %v2351_v42 = vpop.eup %2350  ;;  %v1664_v44 = vsel %vm1663_vm5, %v2347_v43, %v1660_v58  ;;  %v1351_v21 = vmul.f32 1.442695, %v1291_v8  ;;  %vm1677_vm6 = vweird.f32 %v2349_v24  ;;  %v1353_v29 = vmul.f32 1.442695, %v1292_v37 }
 0x204   : > { %v2353_v46 = vpop.eup %2352  ;;  %v1669_v20 = vsel %vm3566_vm15, %v1668_v56, %v1664_v44  ;;  %v1674_v2 = vmul.f32 %v2349_v24, %v1673_v35  ;;  %v1687_v32 = vmul.f32 %v2351_v42, %v3556_v52  ;;  %v1293_v30 = vsub.f32 0.0, %v1168_v7  ;;  %vm1678_vm7 = vmor %vm1676_vm1, %vm1677_vm6 }
 0x205   : > { %v1170_v36 = vpop.f32.mrf.mxu2  ;;  %2046 = vst [vmem:[%s3353_s12 + $0x78] sm:$0xff] %v1669_v20  ;;  %v3596_v60 = vadd.f32 1.0, %v2353_v46  ;;  %2356 = vpow2.f32 %v1351_v21  ;;  %v1695_v59 = vand.u32 2147483647, %v3556_v52  ;;  %v1294_v55 = vsub.f32 0.0, %v1245_v28 }
 0x206   : > { %v1171_v45 = vadd.f32 %v1170_v36, %v3313_v40  ;;  %v1247_v5 = vpop.f32.mrf.mxu3  ;;  %v1675_v25 = vadd.f32 %v2349_v24, %v1674_v2  ;;  %v1688_v51 = vsub.f32 1.0, %v1687_v32  ;;  %vm1692_vm8 = vweird.f32 %v2351_v42 }
 0x207   : > { %v1697_v17 = vand.u32 2147483648, %v3556_v52  ;;  %2358 = vrcp.f32 %v3596_v60  ;;  %v1355_v19 = vmul.f32 1.442695, %v1293_v30  ;;  %vm1691_vm9 = vweird.f32 %v3556_v52 }
 0x208   : > { %v1295_v34 = vsub.f32 0.0, %v1171_v45  ;;  %v1679_v12 = vsel %vm1678_vm7, %v2349_v24, %v1675_v25  ;;  %v1689_v4 = vmul.f32 %v2351_v42, %v1688_v51  ;;  %2360 = vpow2.f32 %v1353_v29  ;;  %v2355_v22 = vpop.eup %2354  ;;  %vm1693_vm10 = vmor %vm1691_vm9, %vm1692_vm8 }
 0x209   : > { %v1684_v57 = vsel %vm3580_vm4, %v1683_v6, %v1679_v12  ;;  %v1710_v62 = vand.u32 2147483647, %v3596_v60  ;;  %v3608_v1 = vadd.f32 1.0, %v2355_v22  ;;  %2362 = vpow2.f32 %v1355_v19 }
 0x20a   : > { %2047 = vst [vmem:[%s3353_s12 + $0x80] sm:$0xff] %v1684_v57  ;;  %v1690_v18 = vadd.f32 %v2351_v42, %v1689_v4  ;;  %v1357_v49 = vmul.f32 1.442695, %v1294_v55  ;;  %vm1696_vm11 = vcmp.eq.f32.partialorder %v1695_v59, 8.507059e+37  ;;  %v1698_v53 = vor.u32 1.1754944e-38, %v1697_v17 }
 0x20b   : > { %v2357_v48 = vpop.eup %2356  ;;  %v1712_v11 = vand.u32 2147483648, %v3596_v60  ;;  %2364 = vrcp.f32 %v3608_v1  ;;  %v1359_v52 = vmul.f32 1.442695, %v1295_v34  ;;  %v1248_v0 = vadd.f32 %v1247_v5, %v3315_v41 }
 0x20c   : > { %v1694_v50 = vsel %vm1693_vm10, %v2351_v42, %v1690_v18  ;;  %v3614_v33 = vadd.f32 1.0, %v2357_v48  ;;  %vm1706_vm0 = vweird.f32 %v3596_v60  ;;  %vm3619_vm12 = vcmp.eq.f32.partialorder %v1710_v62, 8.507059e+37 }
 0x20d   : > { %v1173_v43 = vpop.f32.mrf.mxu2  ;;  %v2359_v16 = vpop.eup %2358  ;;  %v1699_v3 = vsel %vm1696_vm11, %v1698_v53, %v1694_v50  ;;  %2366 = vpow2.f32 %v1357_v49  ;;  %v1713_v15 = vor.u32 1.1754944e-38, %v1712_v11  ;;  %v1725_v56 = vand.u32 2147483647, %v3608_v1 }
 0x20e   : > { %v2361_v9 = vpop.eup %2360  ;;  %2048 = vst [vmem:[%s3353_s12 + $0x88] sm:$0xff] %v1699_v3  ;;  %v1702_v14 = vmul.f32 %v2359_v16, %v3596_v60  ;;  %v1250_v39 = vpop.f32.mrf.mxu3  ;;  %v1727_v63 = vand.u32 2147483648, %v3608_v1  ;;  %2368 = vrcp.f32 %v3614_v33  ;;  %v1296_v61 = vsub.f32 0.0, %v1248_v0 }
 0x20f   : > { %v2363_v23 = vpop.eup %2362  ;;  %v3626_v27 = vadd.f32 1.0, %v2361_v9  ;;  %2370 = vpow2.f32 %v1359_v52  ;;  %vm1707_vm13 = vweird.f32 %v2359_v16  ;;  %v1174_v54 = vadd.f32 %v1173_v43, %v3313_v40 }
 0x210   : > { %v1703_v24 = vsub.f32 1.0, %v1702_v14  ;;  %v3628_v31 = vadd.f32 1.0, %v2363_v23  ;;  %v3632_v47 = vadd.f32 %v1250_v39, %v3315_v41  ;;  %v1740_v13 = vand.u32 2147483647, %v3614_v33  ;;  %vm1708_vm2 = vmor %vm1706_vm0, %vm1707_vm13 }
 0x211   : > { %v2365_v26 = vpop.eup %2364  ;;  %v1742_v58 = vand.u32 2147483648, %v3614_v33  ;;  %2372 = vrcp.f32 %v3626_v27  ;;  %vm1721_vm14 = vweird.f32 %v3608_v1  ;;  %vm3639_vm15 = vcmp.eq.f32.partialorder %v1725_v56, 8.507059e+37 }
 0x212   : > { %v1704_v6 = vmul.f32 %v2359_v16, %v1703_v24  ;;  %v1717_v38 = vmul.f32 %v2365_v26, %v3608_v1  ;;  %v1728_v35 = vor.u32 1.1754944e-38, %v1727_v63  ;;  %vm1736_vm1 = vweird.f32 %v3614_v33 }
 0x213   : > { %v2367_v37 = vpop.eup %2366  ;;  %2374 = vrcp.f32 %v3628_v31  ;;  %v1361_v28 = vmul.f32 1.442695, %v1296_v61  ;;  %v1755_v21 = vand.u32 2147483647, %v3626_v27  ;;  %v1297_v45 = vsub.f32 0.0, %v1174_v54 }
 0x214   : > { %v1705_v7 = vadd.f32 %v2359_v16, %v1704_v6  ;;  %v2369_v42 = vpop.eup %2368  ;;  %v1718_v44 = vsub.f32 1.0, %v1717_v38  ;;  %v1298_v46 = vsub.f32 0.0, %v3632_v47  ;;  %vm3653_vm3 = vcmp.eq.f32.partialorder %v1740_v13, 8.507059e+37 }
 0x215   : > { %v3645_v36 = vpop.f32.mrf.mxu2  ;;  %v2371_v20 = vpop.eup %2370  ;;  %v1732_v32 = vmul.f32 %v2369_v42, %v3614_v33  ;;  %v1743_v29 = vor.u32 1.1754944e-38, %v1742_v58  ;;  %v1757_v30 = vand.u32 2147483648, %v3626_v27  ;;  %vm1722_vm4 = vweird.f32 %v2365_v26 }
 0x216   : > { %v1709_v2 = vsel %vm1708_vm2, %v2359_v16, %v1705_v7  ;;  %v1719_v25 = vmul.f32 %v2365_v26, %v1718_v44  ;;  %v3660_v51 = vadd.f32 1.0, %v2367_v37  ;;  %vm1751_vm5 = vweird.f32 %v3626_v27  ;;  %v1253_v34 = vpop.f32.mrf.mxu3  ;;  %vm1723_vm8 = vmor %vm1721_vm14, %vm1722_vm4 }
 0x217   : > { %v1714_v60 = vsel %vm3619_vm12, %v1713_v15, %v1709_v2  ;;  %v2373_v59 = vpop.eup %2372  ;;  %v1733_v55 = vsub.f32 1.0, %v1732_v32  ;;  %v1770_v17 = vand.u32 2147483647, %v3628_v31  ;;  %2376 = vpow2.f32 %v1361_v28 }
 0x218   : > { %2049 = vst [vmem:[%s3353_s12 + $0x90] sm:$0xff] %v1714_v60  ;;  %v1720_v12 = vadd.f32 %v2365_v26, %v1719_v25  ;;  %v1747_v4 = vmul.f32 %v2373_v59, %v3626_v27  ;;  %vm3666_vm6 = vcmp.eq.f32.partialorder %v1755_v21, 8.507059e+37  ;;  %vm1766_vm7 = vweird.f32 %v3628_v31 }
 0x219   : > { %2378 = vrcp.f32 %v3660_v51  ;;  %v3672_v22 = vadd.f32 1.0, %v2371_v20  ;;  %v2375_v57 = vpop.eup %2374  ;;  %v1734_v62 = vmul.f32 %v2369_v42, %v1733_v55  ;;  %vm1737_vm9 = vweird.f32 %v2369_v42 }
 0x21a   : > { %v1758_v18 = vor.u32 1.1754944e-38, %v1757_v30  ;;  %v1363_v49 = vmul.f32 1.442695, %v1297_v45  ;;  %v1724_v43 = vsel %vm1723_vm8, %v2365_v26, %v1720_v12  ;;  %v1748_v48 = vsub.f32 1.0, %v1747_v4  ;;  %vm1738_vm11 = vmor %vm1736_vm1, %vm1737_vm9 }
 0x21b   : > { %v1762_v53 = vmul.f32 %v2375_v57, %v3628_v31  ;;  %v1772_v11 = vand.u32 2147483648, %v3628_v31  ;;  %v1729_v50 = vsel %vm3639_vm15, %v1728_v35, %v1724_v43  ;;  %v1735_v52 = vadd.f32 %v2369_v42, %v1734_v62 }
 0x21c   : > { %vm1752_vm10 = vweird.f32 %v2373_v59  ;;  %v1785_v0 = vand.u32 2147483647, %v3660_v51  ;;  %2050 = vst [vmem:[%s3353_s12 + $0x98] sm:$0xff] %v1729_v50  ;;  %v1749_v1 = vmul.f32 %v2373_v59, %v1748_v48  ;;  %v1787_v3 = vand.u32 2147483648, %v3660_v51 }
 0x21d   : > { %v1763_v16 = vsub.f32 1.0, %v1762_v53  ;;  %2380 = vrcp.f32 %v3672_v22  ;;  %v2377_v9 = vpop.eup %2376  ;;  %v1739_v14 = vsel %vm1738_vm11, %v2369_v42, %v1735_v52  ;;  %vm1767_vm0 = vweird.f32 %v2375_v57  ;;  %v1179_v39 = vpop.f32.mrf.mxu2  ;;  %vm1753_vm13 = vmor %vm1751_vm5, %vm1752_vm10 }
 0x21e   : > { %vm3687_vm12 = vcmp.eq.f32.partialorder %v1770_v17, 8.507059e+37  ;;  %2382 = vpow2.f32 %v1363_v49  ;;  %v1744_v33 = vsel %vm3653_vm3, %v1743_v29, %v1739_v14  ;;  %v1750_v56 = vadd.f32 %v2373_v59, %v1749_v1  ;;  %vm1768_vm1 = vmor %vm1766_vm7, %vm1767_vm0  ;;  %v1256_v35 = vpop.f32.mrf.mxu3 }
 0x21f   : > { %v2379_v15 = vpop.eup %2378  ;;  %v1764_v63 = vmul.f32 %v2375_v57, %v1763_v16  ;;  %v3693_v23 = vadd.f32 1.0, %v2377_v9  ;;  %2051 = vst [vmem:[%s3353_s12 + $0xa0] sm:$0xff] %v1744_v33  ;;  %v1773_v24 = vor.u32 1.1754944e-38, %v1772_v11  ;;  %vm1781_vm14 = vweird.f32 %v3660_v51 }
 0x220   : > { %v1777_v61 = vmul.f32 %v2379_v15, %v3660_v51  ;;  %vm3701_vm15 = vcmp.eq.f32.partialorder %v1785_v0, 8.507059e+37  ;;  %v1754_v26 = vsel %vm1753_vm13, %v2373_v59, %v1750_v56  ;;  %v1788_v13 = vor.u32 1.1754944e-38, %v1787_v3 }
 0x221   : > { %v1765_v6 = vadd.f32 %v2375_v57, %v1764_v63  ;;  %2384 = vrcp.f32 %v3693_v23  ;;  %v1759_v58 = vsel %vm3666_vm6, %v1758_v18, %v1754_v26  ;;  %v1800_v38 = vand.u32 2147483647, %v3672_v22 }
 0x222   : > { %v1778_v27 = vsub.f32 1.0, %v1777_v61  ;;  %v1802_v8 = vand.u32 2147483648, %v3672_v22  ;;  %2052 = vst [vmem:[%s3353_s12 + $0xa8] sm:$0xff] %v1759_v58  ;;  %v1365_v28 = vmul.f32 1.442695, %v1298_v46  ;;  %v1177_v42 = vadd.f32 %v3645_v36, %v3313_v40 }
 0x223   : > { %v2381_v37 = vpop.eup %2380  ;;  %v1769_v7 = vsel %vm1768_vm1, %v2375_v57, %v1765_v6  ;;  %v1254_v44 = vadd.f32 %v1253_v34, %v3315_v41  ;;  %vm1782_vm2 = vweird.f32 %v2379_v15  ;;  %vm1796_vm3 = vweird.f32 %v3672_v22 }
 0x224   : > { %v2383_v31 = vpop.eup %2382  ;;  %v1774_v21 = vsel %vm3687_vm12, %v1773_v24, %v1769_v7  ;;  %v1779_v45 = vmul.f32 %v2379_v15, %v1778_v27  ;;  %v1792_v20 = vmul.f32 %v2381_v37, %v3672_v22  ;;  %v1815_v2 = vand.u32 2147483647, %v3693_v23  ;;  %vm1783_vm4 = vmor %vm1781_vm14, %vm1782_vm2 }
 0x225   : > { %2053 = vst [vmem:[%s3353_s12 + $0xb0] sm:$0xff] %v1774_v21  ;;  %v3725_v47 = vadd.f32 1.0, %v2383_v31  ;;  %2386 = vpow2.f32 %v1365_v28  ;;  %v1299_v32 = vsub.f32 0.0, %v1177_v42  ;;  %v1300_v5 = vsub.f32 0.0, %v1254_v44  ;;  %v1182_v17 = vpop.f32.mrf.mxu2 }
 0x226   : > { %v1780_v46 = vadd.f32 %v2379_v15, %v1779_v45  ;;  %v1793_v36 = vsub.f32 1.0, %v1792_v20  ;;  %vm3729_vm5 = vcmp.eq.f32.partialorder %v1800_v38, 8.507059e+37  ;;  %v1803_v60 = vor.u32 1.1754944e-38, %v1802_v8  ;;  %v1259_v52 = vpop.f32.mrf.mxu3 }
 0x227   : > { %v2385_v29 = vpop.eup %2384  ;;  %vm1811_vm6 = vweird.f32 %v3693_v23  ;;  %2388 = vrcp.f32 %v3725_v47  ;;  %vm1797_vm7 = vweird.f32 %v2381_v37  ;;  %vm3738_vm8 = vcmp.eq.f32.partialorder %v1815_v2, 8.507059e+37 }
 0x228   : > { %v1784_v25 = vsel %vm1783_vm4, %v2379_v15, %v1780_v46  ;;  %v1794_v59 = vmul.f32 %v2381_v37, %v1793_v36  ;;  %v1807_v55 = vmul.f32 %v2385_v29, %v3693_v23  ;;  %v1817_v12 = vand.u32 2147483648, %v3693_v23  ;;  %vm1798_vm9 = vmor %vm1796_vm3, %vm1797_vm7 }
 0x229   : > { %v1789_v34 = vsel %vm3701_vm15, %v1788_v13, %v1784_v25  ;;  %v1367_v4 = vmul.f32 1.442695, %v1299_v32  ;;  %v1369_v62 = vmul.f32 1.442695, %v1300_v5  ;;  %v1180_v18 = vadd.f32 %v1179_v39, %v3313_v40 }
 0x22a   : > { %2054 = vst [vmem:[%s3353_s12 + $0xb8] sm:$0xff] %v1789_v34  ;;  %v1795_v19 = vadd.f32 %v2381_v37, %v1794_v59  ;;  %v1808_v57 = vsub.f32 1.0, %v1807_v55  ;;  %vm1812_vm10 = vweird.f32 %v2385_v29  ;;  %v1257_v43 = vadd.f32 %v1256_v35, %v3315_v41 }
 0x22b   : > { %v2387_v49 = vpop.eup %2386  ;;  %2390 = vpow2.f32 %v1367_v4  ;;  %v1183_v48 = vadd.f32 %v1182_v17, %v3313_v40  ;;  %v1301_v16 = vsub.f32 0.0, %v1180_v18  ;;  %v1818_v14 = vor.u32 1.1754944e-38, %v1817_v12  ;;  %vm1813_vm11 = vmor %vm1811_vm6, %vm1812_vm10 }
 0x22c   : > { %v1799_v53 = vsel %vm1798_vm9, %v2381_v37, %v1795_v19  ;;  %v1809_v11 = vmul.f32 %v2385_v29, %v1808_v57  ;;  %v3749_v50 = vadd.f32 1.0, %v2387_v49  ;;  %2392 = vpow2.f32 %v1369_v62 }
 0x22d   : > { %v2389_v0 = vpop.eup %2388  ;;  %v1804_v1 = vsel %vm3729_vm5, %v1803_v60, %v1799_v53  ;;  %v1302_v22 = vsub.f32 0.0, %v1257_v43  ;;  %v1303_v3 = vsub.f32 0.0, %v1183_v48  ;;  %v1830_v39 = vand.u32 2147483647, %v3725_v47  ;;  %v1185_v8 = vpop.f32.mrf.mxu2 }
 0x22e   : > { %2055 = vst [vmem:[%s3353_s12 + $0xc0] sm:$0xff] %v1804_v1  ;;  %v1810_v9 = vadd.f32 %v2385_v29, %v1809_v11  ;;  %v1822_v10 = vmul.f32 %v2389_v0, %v3725_v47  ;;  %2394 = vrcp.f32 %v3749_v50  ;;  %v1832_v15 = vand.u32 2147483648, %v3725_v47  ;;  %v1262_v20 = vpop.f32.mrf.mxu3 }
 0x22f   : > { %v1371_v33 = vmul.f32 1.442695, %v1301_v16  ;;  %v1260_v56 = vadd.f32 %v1259_v52, %v3315_v41  ;;  %v1373_v61 = vmul.f32 1.442695, %v1302_v22  ;;  %v1375_v54 = vmul.f32 1.442695, %v1303_v3 }
 0x230   : > { %v1814_v63 = vsel %vm1813_vm11, %v2385_v29, %v1810_v9  ;;  %v1823_v24 = vsub.f32 1.0, %v1822_v10  ;;  %vm1827_vm0 = vweird.f32 %v2389_v0  ;;  %v1845_v23 = vand.u32 2147483647, %v3749_v50 }
 0x231   : > { %v2391_v26 = vpop.eup %2390  ;;  %v1819_v6 = vsel %vm3738_vm8, %v1818_v14, %v1814_v63  ;;  %2396 = vpow2.f32 %v1371_v33  ;;  %v1847_v27 = vand.u32 2147483648, %v3749_v50  ;;  %vm1826_vm12 = vweird.f32 %v3725_v47 }
 0x232   : > { %v2393_v13 = vpop.eup %2392  ;;  %2056 = vst [vmem:[%s3353_s12 + $0xc8] sm:$0xff] %v1819_v6  ;;  %v1824_v58 = vmul.f32 %v2389_v0, %v1823_v24  ;;  %v3767_v38 = vadd.f32 1.0, %v2391_v26  ;;  %2398 = vpow2.f32 %v1373_v61  ;;  %vm1831_vm13 = vcmp.eq.f32.partialorder %v1830_v39, 8.507059e+37  ;;  %vm1828_vm14 = vmor %vm1826_vm12, %vm1827_vm0 }
 0x233   : > { %v3769_v35 = vadd.f32 1.0, %v2393_v13  ;;  %2400 = vpow2.f32 %v1375_v54  ;;  %v1833_v28 = vor.u32 1.1754944e-38, %v1832_v15  ;;  %vm1841_vm15 = vweird.f32 %v3749_v50 }
 0x234   : > { %v2395_v37 = vpop.eup %2394  ;;  %v1825_v7 = vadd.f32 %v2389_v0, %v1824_v58  ;;  %2402 = vrcp.f32 %v3767_v38  ;;  %vm3777_vm1 = vcmp.eq.f32.partialorder %v1845_v23, 8.507059e+37  ;;  %v1848_v21 = vor.u32 1.1754944e-38, %v1847_v27 }
 0x235   : > { %v1837_v42 = vmul.f32 %v2395_v37, %v3749_v50  ;;  %2404 = vrcp.f32 %v3769_v35  ;;  %v1304_v45 = vsub.f32 0.0, %v1260_v56  ;;  %v1860_v36 = vand.u32 2147483647, %v3767_v38  ;;  %v1188_v11 = vpop.f32.mrf.mxu2 }
 0x236   : > { %v1829_v44 = vsel %vm1828_vm14, %v2389_v0, %v1825_v7  ;;  %v1186_v32 = vadd.f32 %v1185_v8, %v3313_v40  ;;  %v1862_v29 = vand.u32 2147483648, %v3767_v38  ;;  %v1875_v30 = vand.u32 2147483647, %v3769_v35  ;;  %v1265_v54 = vpop.f32.mrf.mxu3 }
 0x237   : > { %v2397_v2 = vpop.eup %2396  ;;  %v1834_v47 = vsel %vm1831_vm13, %v1833_v28, %v1829_v44  ;;  %v1838_v46 = vsub.f32 1.0, %v1837_v42  ;;  %v1877_v60 = vand.u32 2147483648, %v3769_v35  ;;  %vm1842_vm2 = vweird.f32 %v2395_v37 }
 0x238   : > { %v2399_v5 = vpop.eup %2398  ;;  %2057 = vst [vmem:[%s3353_s12 + $0xd0] sm:$0xff] %v1834_v47  ;;  %v3787_v25 = vadd.f32 1.0, %v2397_v2  ;;  %v1263_v34 = vadd.f32 %v1262_v20, %v3315_v41  ;;  %vm1856_vm3 = vweird.f32 %v3767_v38  ;;  %vm1871_vm4 = vweird.f32 %v3769_v35  ;;  %vm1843_vm6 = vmor %vm1841_vm15, %vm1842_vm2 }
 0x239   : > { %v2401_v59 = vpop.eup %2400  ;;  %v1839_v55 = vmul.f32 %v2395_v37, %v1838_v46  ;;  %v3789_v17 = vadd.f32 1.0, %v2399_v5  ;;  %v1377_v12 = vmul.f32 1.442695, %v1304_v45  ;;  %vm3796_vm5 = vcmp.eq.f32.partialorder %v1860_v36, 8.507059e+37 }
 0x23a   : > { %v2403_v51 = vpop.eup %2402  ;;  %2406 = vrcp.f32 %v3787_v25  ;;  %v1305_v18 = vsub.f32 0.0, %v1186_v32  ;;  %v1863_v49 = vor.u32 1.1754944e-38, %v1862_v29  ;;  %vm3804_vm7 = vcmp.eq.f32.partialorder %v1875_v30, 8.507059e+37 }
 0x23b   : > { %v2405_v4 = vpop.eup %2404  ;;  %v1840_v19 = vadd.f32 %v2395_v37, %v1839_v55  ;;  %v1852_v57 = vmul.f32 %v2403_v51, %v3767_v38  ;;  %2408 = vrcp.f32 %v3789_v17  ;;  %v1878_v53 = vor.u32 1.1754944e-38, %v1877_v60 }
 0x23c   : > { %v1867_v43 = vmul.f32 %v2405_v4, %v3769_v35  ;;  %v1890_v1 = vand.u32 2147483647, %v3787_v25  ;;  %v1892_v16 = vand.u32 2147483648, %v3787_v25  ;;  %v3812_v3 = vadd.f32 1.0, %v2401_v59 }
 0x23d   : > { %v1844_v52 = vsel %vm1843_vm6, %v2395_v37, %v1840_v19  ;;  %v1853_v0 = vsub.f32 1.0, %v1852_v57  ;;  %v1306_v9 = vsub.f32 0.0, %v1263_v34  ;;  %vm1857_vm8 = vweird.f32 %v2403_v51  ;;  %v1191_v2 = vpop.f32.mrf.mxu2 }
 0x23e   : > { %v1849_v22 = vsel %vm3777_vm1, %v1848_v21, %v1844_v52  ;;  %v1868_v50 = vsub.f32 1.0, %v1867_v43  ;;  %2410 = vpow2.f32 %v1377_v12  ;;  %v1379_v10 = vmul.f32 1.442695, %v1305_v18  ;;  %vm1858_vm0 = vmor %vm1856_vm3, %vm1857_vm8  ;;  %v1268_v62 = vpop.f32.mrf.mxu3 }
 0x23f   : > { %2058 = vst [vmem:[%s3353_s12 + $0xd8] sm:$0xff] %v1849_v22  ;;  %v1854_v14 = vmul.f32 %v2403_v51, %v1853_v0  ;;  %vm1872_vm9 = vweird.f32 %v2405_v4  ;;  %vm1886_vm10 = vweird.f32 %v3787_v25  ;;  %2412 = vrcp.f32 %v3812_v3 }
 0x240   : > { %v2407_v39 = vpop.eup %2406  ;;  %v1869_v15 = vmul.f32 %v2405_v4, %v1868_v50  ;;  %vm3818_vm11 = vcmp.eq.f32.partialorder %v1890_v1, 8.507059e+37  ;;  %v1893_v61 = vor.u32 1.1754944e-38, %v1892_v16  ;;  %vm1901_vm12 = vweird.f32 %v3789_v17  ;;  %vm1873_vm13 = vmor %vm1871_vm4, %vm1872_vm9 }
 0x241   : > { %v2409_v33 = vpop.eup %2408  ;;  %v1855_v56 = vadd.f32 %v2403_v51, %v1854_v14  ;;  %v1882_v63 = vmul.f32 %v2407_v39, %v3787_v25  ;;  %v1905_v23 = vand.u32 2147483647, %v3789_v17  ;;  %v1907_v27 = vand.u32 2147483648, %v3789_v17 }
 0x242   : > { %v1870_v26 = vadd.f32 %v2405_v4, %v1869_v15  ;;  %v1897_v6 = vmul.f32 %v2409_v33, %v3789_v17  ;;  %2414 = vpow2.f32 %v1379_v10  ;;  %vm1887_vm14 = vweird.f32 %v2407_v39 }
 0x243   : > { %v1859_v13 = vsel %vm1858_vm0, %v2403_v51, %v1855_v56  ;;  %v1883_v58 = vsub.f32 1.0, %v1882_v63  ;;  %v1381_v44 = vmul.f32 1.442695, %v1306_v9  ;;  %v1189_v35 = vadd.f32 %v1188_v11, %v3313_v40  ;;  %vm1888_vm2 = vmor %vm1886_vm10, %vm1887_vm14 }
 0x244   : > { %v1864_v38 = vsel %vm3796_vm5, %v1863_v49, %v1859_v13  ;;  %v1874_v8 = vsel %vm1873_vm13, %v2405_v4, %v1870_v26  ;;  %v1898_v37 = vsub.f32 1.0, %v1897_v6  ;;  %v2411_v7 = vpop.eup %2410  ;;  %vm1902_vm15 = vweird.f32 %v2409_v33 }
 0x245   : > { %2059 = vst [vmem:[%s3353_s12 + $0xe0] sm:$0xff] %v1864_v38  ;;  %v1879_v28 = vsel %vm3804_vm7, %v1878_v53, %v1874_v8  ;;  %v1884_v42 = vmul.f32 %v2407_v39, %v1883_v58  ;;  %v2413_v31 = vpop.eup %2412  ;;  %vm3838_vm1 = vcmp.eq.f32.partialorder %v1905_v23, 8.507059e+37  ;;  %v3842_v20 = vadd.f32 1.0, %v2411_v7  ;;  %vm1903_vm3 = vmor %vm1901_vm12, %vm1902_vm15 }
 0x246   : > { %2060 = vst [vmem:[%s3353_s12 + $0xe8] sm:$0xff] %v1879_v28  ;;  %v1899_v21 = vmul.f32 %v2409_v33, %v1898_v37  ;;  %v1908_v46 = vor.u32 1.1754944e-38, %v1907_v27  ;;  %v1912_v36 = vmul.f32 %v2413_v31, %v3812_v3  ;;  %2416 = vpow2.f32 %v1381_v44 }
 0x247   : > { %v1885_v47 = vadd.f32 %v2407_v39, %v1884_v42  ;;  %v1920_v5 = vand.u32 2147483647, %v3812_v3  ;;  %2418 = vrcp.f32 %v3842_v20  ;;  %v1266_v29 = vadd.f32 %v1265_v54, %v3315_v41 }
 0x248   : > { %v1900_v32 = vadd.f32 %v2409_v33, %v1899_v21  ;;  %v2415_v30 = vpop.eup %2414  ;;  %v1913_v59 = vsub.f32 1.0, %v1912_v36  ;;  %v1307_v55 = vsub.f32 0.0, %v1189_v35  ;;  %v1192_v25 = vadd.f32 %v1191_v2, %v3313_v40 }
 0x249   : > { %v1889_v60 = vsel %vm1888_vm2, %v2407_v39, %v1885_v47  ;;  %v1922_v12 = vand.u32 2147483648, %v3812_v3  ;;  %v3858_v4 = vadd.f32 1.0, %v2415_v30  ;;  %vm1917_vm4 = vweird.f32 %v2413_v31 }
 0x24a   : > { %v1894_v34 = vsel %vm3818_vm11, %v1893_v61, %v1889_v60  ;;  %v1904_v51 = vsel %vm1903_vm3, %v2409_v33, %v1900_v32  ;;  %v1914_v57 = vmul.f32 %v2413_v31, %v1913_v59  ;;  %v1383_v17 = vmul.f32 1.442695, %v1307_v55 }
 0x24b   : > { %2061 = vst [vmem:[%s3353_s12 + $0xf0] sm:$0xff] %v1894_v34  ;;  %v1909_v19 = vsel %vm3838_vm1, %v1908_v46, %v1904_v51  ;;  %vm1916_vm5 = vweird.f32 %v3812_v3  ;;  %2420 = vrcp.f32 %v3858_v4  ;;  %v1308_v49 = vsub.f32 0.0, %v1266_v29 }
 0x24c   : > { %2062 = vst [vmem:[%s3353_s12 + $0xf8] sm:$0xff] %v1909_v19  ;;  %v2417_v40 = vpop.eup %2416  ;;  %v1915_v18 = vadd.f32 %v2413_v31, %v1914_v57  ;;  %2422 = vpow2.f32 %v1383_v17  ;;  %v1309_v43 = vsub.f32 0.0, %v1192_v25  ;;  %vm1918_vm6 = vmor %vm1916_vm5, %vm1917_vm4  ;;  %v1923_v53 = vor.u32 1.1754944e-38, %v1922_v12 }
 0x24d   : > { %v2419_v48 = vpop.eup %2418  ;;  %v3866_v11 = vadd.f32 1.0, %v2417_v40  ;;  %v1269_v52 = vadd.f32 %v1268_v62, %v3315_v41  ;;  %vm1921_vm7 = vcmp.eq.f32.partialorder %v1920_v5, 8.507059e+37  ;;  %v1385_v16 = vmul.f32 1.442695, %v1308_v49 }
 0x24e   : > { %v1919_v0 = vsel %vm1918_vm6, %v2413_v31, %v1915_v18  ;;  %v1927_v1 = vmul.f32 %v2419_v48, %v3842_v20  ;;  %v1387_v3 = vmul.f32 1.442695, %v1309_v43  ;;  %v1935_v14 = vand.u32 2147483647, %v3842_v20 }
 0x24f   : > { %v1924_v22 = vsel %vm1921_vm7, %v1923_v53, %v1919_v0  ;;  %2424 = vrcp.f32 %v3866_v11  ;;  %v1937_v10 = vand.u32 2147483648, %v3842_v20  ;;  %v1310_v39 = vsub.f32 0.0, %v1269_v52 }
 0x250   : > { %2063 = vst [vmem:[%s3353_s12 + $0x100] sm:$0xff] %v1924_v22  ;;  %v1928_v50 = vsub.f32 1.0, %v1927_v1  ;;  %2426 = vpow2.f32 %v1385_v16  ;;  %vm1932_vm8 = vweird.f32 %v2419_v48  ;;  %vm1931_vm9 = vweird.f32 %v3842_v20 }
 0x251   : > { %v2421_v9 = vpop.eup %2420  ;;  %2428 = vpow2.f32 %v1387_v3  ;;  %v1950_v61 = vand.u32 2147483647, %v3858_v4  ;;  %v1389_v54 = vmul.f32 1.442695, %v1310_v39  ;;  %vm1933_vm10 = vmor %vm1931_vm9, %vm1932_vm8  ;;  %vm1936_vm11 = vcmp.eq.f32.partialorder %v1935_v14, 8.507059e+37 }
 0x252   : > { %v2423_v15 = vpop.eup %2422  ;;  %v1929_v41 = vmul.f32 %v2419_v48, %v1928_v50  ;;  %v1942_v33 = vmul.f32 %v2421_v9, %v3858_v4  ;;  %v1938_v6 = vor.u32 1.1754944e-38, %v1937_v10  ;;  %v1952_v23 = vand.u32 2147483648, %v3858_v4 }
 0x253   : > { %v3876_v56 = vadd.f32 1.0, %v2423_v15  ;;  %vm1947_vm0 = vweird.f32 %v2421_v9  ;;  %vm1946_vm12 = vweird.f32 %v3858_v4  ;;  %vm1951_vm13 = vcmp.eq.f32.partialorder %v1950_v61, 8.507059e+37 }
 0x254   : > { %v1930_v63 = vadd.f32 %v2419_v48, %v1929_v41  ;;  %v1943_v24 = vsub.f32 1.0, %v1942_v33  ;;  %vm1948_vm14 = vmor %vm1946_vm12, %vm1947_vm0  ;;  %v1953_v44 = vor.u32 1.1754944e-38, %v1952_v23  ;;  %v1965_v35 = vand.u32 2147483647, %v3866_v11 }
 0x255   : > { %v2425_v26 = vpop.eup %2424  ;;  %2430 = vrcp.f32 %v3876_v56  ;;  %v1967_v31 = vand.u32 2147483648, %v3866_v11  ;;  %vm1961_vm1 = vweird.f32 %v3866_v11  ;;  %v1980_v55 = vand.u32 2147483647, %v3876_v56 }
 0x256   : > { %v2427_v13 = vpop.eup %2426  ;;  %v1934_v58 = vsel %vm1933_vm10, %v2419_v48, %v1930_v63  ;;  %v1944_v27 = vmul.f32 %v2421_v9, %v1943_v24  ;;  %v1957_v38 = vmul.f32 %v2425_v26, %v3866_v11  ;;  %2432 = vpow2.f32 %v1389_v54 }
 0x257   : > { %v1939_v8 = vsel %vm1936_vm11, %v1938_v6, %v1934_v58  ;;  %v3883_v37 = vadd.f32 1.0, %v2427_v13  ;;  %v2429_v42 = vpop.eup %2428  ;;  %vm1962_vm15 = vweird.f32 %v2425_v26  ;;  %v1968_v32 = vor.u32 1.1754944e-38, %v1967_v31 }
 0x258   : > { %2064 = vst [vmem:[%s3353_s12 + $0x108] sm:$0xff] %v1939_v8  ;;  %v1945_v7 = vadd.f32 %v2421_v9, %v1944_v27  ;;  %v1958_v28 = vsub.f32 1.0, %v1957_v38  ;;  %v3889_v20 = vadd.f32 1.0, %v2429_v42  ;;  %vm1963_vm2 = vmor %vm1961_vm1, %vm1962_vm15  ;;  %vm1966_vm3 = vcmp.eq.f32.partialorder %v1965_v35, 8.507059e+37 }
 0x259   : > { %2434 = vrcp.f32 %v3883_v37  ;;  %v1982_v25 = vand.u32 2147483648, %v3876_v56  ;;  %vm1976_vm5 = vweird.f32 %v3876_v56  ;;  %vm1981_vm7 = vcmp.eq.f32.partialorder %v1980_v55, 8.507059e+37 }
 0x25a   : > { %v1949_v21 = vsel %vm1948_vm14, %v2421_v9, %v1945_v7  ;;  %v1959_v45 = vmul.f32 %v2425_v26, %v1958_v28  ;;  %2436 = vrcp.f32 %v3889_v20  ;;  %v1997_v62 = vand.u32 2147483648, %v3883_v37 }
 0x25b   : > { %v2431_v2 = vpop.eup %2430  ;;  %v1954_v47 = vsel %vm1951_vm13, %v1953_v44, %v1949_v21  ;;  %v1983_v17 = vor.u32 1.1754944e-38, %v1982_v25  ;;  %v1995_v43 = vand.u32 2147483647, %v3883_v37  ;;  %vm1991_vm9 = vweird.f32 %v3883_v37 }
 0x25c   : > { %2065 = vst [vmem:[%s3353_s12 + $0x110] sm:$0xff] %v1954_v47  ;;  %v1960_v46 = vadd.f32 %v2425_v26, %v1959_v45  ;;  %v1972_v36 = vmul.f32 %v2431_v2, %v3876_v56  ;;  %v2433_v5 = vpop.eup %2432  ;;  %vm1977_vm4 = vweird.f32 %v2431_v2  ;;  %v2012_v52 = vand.u32 2147483648, %v3889_v20 }
 0x25d   : > { %v1430_v34 = vadd.f32 1.0, %v2433_v5  ;;  %vm1978_vm6 = vmor %vm1976_vm5, %vm1977_vm4  ;;  %v1998_v1 = vor.u32 1.1754944e-38, %v1997_v62  ;;  %v2010_v22 = vand.u32 2147483647, %v3889_v20  ;;  %vm1996_vm0 = vcmp.eq.f32.partialorder %v1995_v43, 8.507059e+37 }
 0x25e   : > { %v1964_v29 = vsel %vm1963_vm2, %v2425_v26, %v1960_v46  ;;  %v1973_v30 = vsub.f32 1.0, %v1972_v36  ;;  %vm2006_vm12 = vweird.f32 %v3889_v20  ;;  %v2013_v10 = vor.u32 1.1754944e-38, %v2012_v52 }
 0x25f   : > { %v2435_v60 = vpop.eup %2434  ;;  %v1969_v59 = vsel %vm1966_vm3, %v1968_v32, %v1964_v29  ;;  %2438 = vrcp.f32 %v1430_v34  ;;  %vm2011_vm14 = vcmp.eq.f32.partialorder %v2010_v22, 8.507059e+37  ;;  %v2027_v41 = vand.u32 2147483648, %v1430_v34 }
 0x260   : > { %2066 = vst [vmem:[%s3353_s12 + $0x118] sm:$0xff] %v1969_v59  ;;  %v1974_v51 = vmul.f32 %v2431_v2, %v1973_v30  ;;  %v1987_v12 = vmul.f32 %v2435_v60, %v3883_v37  ;;  %v2437_v4 = vpop.eup %2436  ;;  %vm1992_vm8 = vweird.f32 %v2435_v60  ;;  %v2025_v63 = vand.u32 2147483647, %v1430_v34 }
 0x261   : > { %v2002_v40 = vmul.f32 %v2437_v4, %v3889_v20  ;;  %vm1993_vm10 = vmor %vm1991_vm9, %vm1992_vm8  ;;  %vm2007_vm11 = vweird.f32 %v2437_v4  ;;  %vm2021_vm1 = vweird.f32 %v1430_v34  ;;  %v2028_v61 = vor.u32 1.1754944e-38, %v2027_v41 }
 0x262   : > { %v1975_v19 = vadd.f32 %v2431_v2, %v1974_v51  ;;  %v1988_v57 = vsub.f32 1.0, %v1987_v12  ;;  %vm2008_vm13 = vmor %vm2006_vm12, %vm2007_vm11  ;;  %vm2026_vm3 = vcmp.eq.f32.partialorder %v2025_v63, 8.507059e+37 }
 0x263   : > { %v2003_v53 = vsub.f32 1.0, %v2002_v40 }
 0x264   : > { %v1979_v18 = vsel %vm1978_vm6, %v2431_v2, %v1975_v19  ;;  %v1989_v49 = vmul.f32 %v2435_v60, %v1988_v57 }
 0x265   : > { %v1984_v48 = vsel %vm1981_vm7, %v1983_v17, %v1979_v18  ;;  %v2439_v0 = vpop.eup %2438  ;;  %v2004_v16 = vmul.f32 %v2437_v4, %v2003_v53 }
 0x266   : > { %2067 = vst [vmem:[%s3353_s12 + $0x120] sm:$0xff] %v1984_v48  ;;  %v1990_v11 = vadd.f32 %v2435_v60, %v1989_v49  ;;  %v2017_v3 = vmul.f32 %v2439_v0, %v1430_v34  ;;  %vm2022_vm15 = vweird.f32 %v2439_v0 }
 0x267   : > { %v2005_v14 = vadd.f32 %v2437_v4, %v2004_v16  ;;  %vm2023_vm2 = vmor %vm2021_vm1, %vm2022_vm15 }
 0x268   : > { %v1994_v50 = vsel %vm1993_vm10, %v2435_v60, %v1990_v11  ;;  %v2018_v39 = vsub.f32 1.0, %v2017_v3 }
 0x269   : > { %v1999_v9 = vsel %vm1996_vm0, %v1998_v1, %v1994_v50  ;;  %v2009_v15 = vsel %vm2008_vm13, %v2437_v4, %v2005_v14 }
 0x26a   : > { %2068 = vst [vmem:[%s3353_s12 + $0x128] sm:$0xff] %v1999_v9  ;;  %v2014_v33 = vsel %vm2011_vm14, %v2013_v10, %v2009_v15  ;;  %v2019_v56 = vmul.f32 %v2439_v0, %v2018_v39 }
 0x26b   : > { %2069 = vst [vmem:[%s3353_s12 + $0x130] sm:$0xff] %v2014_v33 }
 0x26c   : > { %v2020_v24 = vadd.f32 %v2439_v0, %v2019_v56 }
 0x26e   : > { %v2024_v54 = vsel %vm2023_vm2, %v2439_v0, %v2020_v24 }
 0x26f   : > { %v2029_v26 = vsel %vm2026_vm3, %v2028_v61, %v2024_v54 }
 0x270   : > { %2070 = vst [vmem:[%s3353_s12 + $0x138] sm:$0xff] %v2029_v26 }
 0x271   : > { %2467 = shalt.err (!%p2464_p5)
}
 0x272   : > { %s2521_s25 = smov 256   ;;  %s2522_s12 = smov 16  }
 0x273   : > { %2213 = dma.vmem_to_hbm [thread:$0]  (%p2608_p4), %s2088_s11, 5120, %s2090_s21, %s2072_s22, %s2521_s25, %s2521_s25, %s2522_s12  }
 0x274 PF: > { %p2219_p6 = scmp.ge.s32.totalorder %s2518_s10, 2  ;;  %s2104_s20 = sand.u32 1, %s2498_s27  }
 0x275   : > { %s2105_s16 = scalar_lea.sflag [#allocation4], %s2104_s20 }
 0x276   : > { %p2216_p7 = pnand %p2219_p6, %p2615_p8 }
 0x278   : > { %p2217_p9 = pneg %p2216_p7 }
 0x27a   : > { %2493 = dma.done.wait (%p2217_p9), %s2105_s16, 5120  }
 0x27b   : > { %2495 = vsyncadd (%p2217_p9), %s2105_s16, 4294962176  ;;  %s21_s10 = sadd.s32 1, %s2518_s10   ;;  %s4013_s27 = smov %s2502_s28 }
 0x27c   : > { %p18_p10 = scmp.ge.s32.totalorder %s21_s10, 4   ;;  %s4014_s28 = smov %s2506_s29 }
 0x27d   : > { %s4015_s29 = smov %s2621_s18  ;;  %s4016_s30 = smov %s2514_s9 }
 0x27e   : > { %s4017_s9 = smov %s4019_s13  ;;  %20 = sbr.rel (!%p18_p10) target bundleno = 4 (0x4), region = 96 }
 0x283   :  { %2111 = vsyncpa [#allocation4], 1 }
 0x284   :  { %2113 = vsyncpa [#allocation4 + $0x1], 1 }

</bundles_post_ra>
